<compile_context>
chip_gen: v7x
topology: tpu7x:2x2x1
jax: 0.10.0
libtpu: 0.0.40
codegen_flags: <defaults>
</compile_context>

<pallas_src>
import jax
import jax.numpy as jnp
from jax.experimental import pallas as pl
from jax.experimental.pallas import tpu as pltpu

C1 = 0.01 ** 2
C2 = 0.03 ** 2


def _ssim_kernel(x_ref, y_ref, o_ref):
    # x_ref / y_ref / o_ref: (B, H, W) unpadded planes.
    x = x_ref[...]
    y = y_ref[...]

    def rowsum3(a):
        # 3-tap sum along the lane (W) axis with 1-px reflection (pad index -1 -> 1,
        # index W -> W-2), matching ReflectionPad2d(1).
        left = jnp.concatenate([a[:, :, 1:2], a[:, :, :-1]], axis=2)
        right = jnp.concatenate([a[:, :, 1:], a[:, :, -2:-1]], axis=2)
        return left + a + right

    def colsum3(a):
        # 3-tap sum along the sublane (H) axis with 1-px reflection.
        up = jnp.concatenate([a[:, 1:2, :], a[:, :-1, :]], axis=1)
        down = jnp.concatenate([a[:, 1:, :], a[:, -2:-1, :]], axis=1)
        return up + a + down

    def pool9(a):
        # Separable 3x3 window SUM (== 9 * avg_pool3x3 of the reflection-padded plane).
        return colsum3(rowsum3(a))

    sx = pool9(x)
    sy = pool9(y)
    sxx = pool9(x * x)
    syy = pool9(y * y)
    sxy = pool9(x * y)

    # SSIM with the 1/9 pooling scale folded in:
    #   mu_x = sx/9, sigma_x = (9*sxx - sx^2)/81, sigma_xy = (9*sxy - sx*sy)/81
    # The 81^2 factors cancel in the numerator/denominator ratio.
    c1 = 81.0 * C1
    c2 = 81.0 * C2
    sxsy = sx * sy
    sx2 = sx * sx
    sy2 = sy * sy
    num = (2.0 * sxsy + c1) * (2.0 * (9.0 * sxy - sxsy) + c2)
    den = (sx2 + sy2 + c1) * (9.0 * (sxx + syy) - sx2 - sy2 + c2)
    out = (1.0 - num * pl.reciprocal(den, approx=False)) * 0.5
    o_ref[...] = jnp.clip(out, 0.0, 1.0)


def _pick_block_planes(nc, h, w, target_block_bytes=1 << 20):
    """Largest divisor B of nc with B*h*w*4 <= target, preferring >=2 grid steps."""
    plane_bytes = h * w * 4
    divs = [b for b in range(1, nc + 1)
            if nc % b == 0 and b * plane_bytes <= target_block_bytes]
    if not divs:
        return 1
    multi_step = [b for b in divs if nc // b >= 2]
    return max(multi_step) if multi_step else max(divs)


def ssim_loss(x, y):
    """x, y: (N, C, H, W) float -> (N, C, H, W) float32 SSIM loss map in [0, 1]."""
    assert x.shape == y.shape
    N, C, H, W = x.shape
    assert H >= 2 and W >= 2, "ReflectionPad2d(1) needs spatial dims >= 2"
    x = x.astype(jnp.float32).reshape(N * C, H, W)
    y = y.astype(jnp.float32).reshape(N * C, H, W)

    NC = N * C
    B = _pick_block_planes(NC, H, W)
    grid = (NC // B,)

    out = pl.pallas_call(
        _ssim_kernel,
        out_shape=jax.ShapeDtypeStruct((NC, H, W), jnp.float32),
        grid_spec=pltpu.PrefetchScalarGridSpec(
            num_scalar_prefetch=0,
            grid=grid,
            in_specs=[
                pl.BlockSpec((B, H, W), lambda i: (i, 0, 0)),
                pl.BlockSpec((B, H, W), lambda i: (i, 0, 0)),
            ],
            out_specs=pl.BlockSpec((B, H, W), lambda i: (i, 0, 0)),
        ),
        compiler_params=pltpu.CompilerParams(
            dimension_semantics=("parallel",),
            vmem_limit_bytes=48 * 1024 * 1024,
        ),
    )(x, y)

    return out.reshape(N, C, H, W)


def _ssim_ref(x, y):
    """Pure-JAX reference mirroring the PyTorch module exactly."""
    pad = ((0, 0), (0, 0), (1, 1), (1, 1))
    xr = jnp.pad(x, pad, mode="reflect")
    yr = jnp.pad(y, pad, mode="reflect")

    def avg_pool3(a):
        return jax.lax.reduce_window(
            a, 0.0, jax.lax.add,
            window_dimensions=(1, 1, 3, 3),
            window_strides=(1, 1, 1, 1),
            padding="VALID",
        ) / 9.0

    mu_x = avg_pool3(xr)
    mu_y = avg_pool3(yr)
    sigma_x = avg_pool3(xr ** 2) - mu_x ** 2
    sigma_y = avg_pool3(yr ** 2) - mu_y ** 2
    sigma_xy = avg_pool3(xr * yr) - mu_x * mu_y
    n = (2 * mu_x * mu_y + C1) * (2 * sigma_xy + C2)
    d = (mu_x ** 2 + mu_y ** 2 + C1) * (sigma_x + sigma_y + C2)
    return jnp.clip((1 - n / d) / 2, 0.0, 1.0)


if __name__ == "__main__":
    key = jax.random.PRNGKey(0)
    kx, ky = jax.random.split(key)
    N, C, H, W = 2, 4, 16, 16
    x = jax.random.uniform(kx, (N, C, H, W), dtype=jnp.float32)
    y = jax.random.uniform(ky, (N, C, H, W), dtype=jnp.float32)

    out = jax.block_until_ready(ssim_loss(x, y))
    ref = jax.block_until_ready(_ssim_ref(x, y))

    assert out.shape == (N, C, H, W)
    assert jnp.allclose(out, ref, atol=3e-5, rtol=1e-5), (
        f"max abs diff {jnp.max(jnp.abs(out - ref))}")
    print("KERNEL_OK")
</pallas_src>

<mosaic_0001>
module attributes {stable_mosaic.version = 11 : i64} {
  func.func @_ssim_kernel(%arg0: i32, %arg1: memref<4x16x16xf32, #tpu.memory_space<vmem>>, %arg2: memref<4x16x16xf32, #tpu.memory_space<vmem>>, %arg3: memref<4x16x16xf32, #tpu.memory_space<vmem>>) attributes {dimension_semantics = [#tpu.dimension_semantics<parallel>], iteration_bounds = array<i64: 2>, scalar_prefetch = 0 : i64, scratch_operands = 0 : i64, tpu.core_type = #tpu.core_type<tc>, window_params = [{transform_indices = @transform_0, window_bounds = array<i64: 4, 16, 16>}, {transform_indices = @transform_1, window_bounds = array<i64: 4, 16, 16>}, {transform_indices = @transform_2, window_bounds = array<i64: 4, 16, 16>}]} {
    %c0 = arith.constant 0 : index
    %c0_0 = arith.constant 0 : index
    %c0_1 = arith.constant 0 : index
    %0 = vector.load %arg1[%c0, %c0_0, %c0_1] : memref<4x16x16xf32, #tpu.memory_space<vmem>>, vector<4x16x16xf32>
    %c0_2 = arith.constant 0 : index
    %c0_3 = arith.constant 0 : index
    %c0_4 = arith.constant 0 : index
    %1 = vector.load %arg2[%c0_2, %c0_3, %c0_4] : memref<4x16x16xf32, #tpu.memory_space<vmem>>, vector<4x16x16xf32>
    %2 = vector.extract_strided_slice %0 {offsets = [0, 0, 1], sizes = [4, 16, 1], strides = [1, 1, 1]} : vector<4x16x16xf32> to vector<4x16x1xf32>
    %3 = vector.extract_strided_slice %0 {offsets = [0, 0, 0], sizes = [4, 16, 15], strides = [1, 1, 1]} : vector<4x16x16xf32> to vector<4x16x15xf32>
    %4 = tpu.concatenate %2, %3 in 2 : vector<4x16x1xf32>, vector<4x16x15xf32> -> vector<4x16x16xf32>
    %5 = vector.extract_strided_slice %0 {offsets = [0, 0, 1], sizes = [4, 16, 15], strides = [1, 1, 1]} : vector<4x16x16xf32> to vector<4x16x15xf32>
    %6 = vector.extract_strided_slice %0 {offsets = [0, 0, 14], sizes = [4, 16, 1], strides = [1, 1, 1]} : vector<4x16x16xf32> to vector<4x16x1xf32>
    %7 = tpu.concatenate %5, %6 in 2 : vector<4x16x15xf32>, vector<4x16x1xf32> -> vector<4x16x16xf32>
    %8 = arith.addf %4, %0 : vector<4x16x16xf32>
    %9 = arith.addf %8, %7 : vector<4x16x16xf32>
    %10 = vector.extract_strided_slice %9 {offsets = [0, 1, 0], sizes = [4, 1, 16], strides = [1, 1, 1]} : vector<4x16x16xf32> to vector<4x1x16xf32>
    %11 = vector.extract_strided_slice %9 {offsets = [0, 0, 0], sizes = [4, 15, 16], strides = [1, 1, 1]} : vector<4x16x16xf32> to vector<4x15x16xf32>
    %12 = tpu.concatenate %10, %11 in 1 : vector<4x1x16xf32>, vector<4x15x16xf32> -> vector<4x16x16xf32>
    %13 = vector.extract_strided_slice %9 {offsets = [0, 1, 0], sizes = [4, 15, 16], strides = [1, 1, 1]} : vector<4x16x16xf32> to vector<4x15x16xf32>
    %14 = vector.extract_strided_slice %9 {offsets = [0, 14, 0], sizes = [4, 1, 16], strides = [1, 1, 1]} : vector<4x16x16xf32> to vector<4x1x16xf32>
    %15 = tpu.concatenate %13, %14 in 1 : vector<4x15x16xf32>, vector<4x1x16xf32> -> vector<4x16x16xf32>
    %16 = arith.addf %12, %9 : vector<4x16x16xf32>
    %17 = arith.addf %16, %15 : vector<4x16x16xf32>
    %18 = vector.extract_strided_slice %1 {offsets = [0, 0, 1], sizes = [4, 16, 1], strides = [1, 1, 1]} : vector<4x16x16xf32> to vector<4x16x1xf32>
    %19 = vector.extract_strided_slice %1 {offsets = [0, 0, 0], sizes = [4, 16, 15], strides = [1, 1, 1]} : vector<4x16x16xf32> to vector<4x16x15xf32>
    %20 = tpu.concatenate %18, %19 in 2 : vector<4x16x1xf32>, vector<4x16x15xf32> -> vector<4x16x16xf32>
    %21 = vector.extract_strided_slice %1 {offsets = [0, 0, 1], sizes = [4, 16, 15], strides = [1, 1, 1]} : vector<4x16x16xf32> to vector<4x16x15xf32>
    %22 = vector.extract_strided_slice %1 {offsets = [0, 0, 14], sizes = [4, 16, 1], strides = [1, 1, 1]} : vector<4x16x16xf32> to vector<4x16x1xf32>
    %23 = tpu.concatenate %21, %22 in 2 : vector<4x16x15xf32>, vector<4x16x1xf32> -> vector<4x16x16xf32>
    %24 = arith.addf %20, %1 : vector<4x16x16xf32>
    %25 = arith.addf %24, %23 : vector<4x16x16xf32>
    %26 = vector.extract_strided_slice %25 {offsets = [0, 1, 0], sizes = [4, 1, 16], strides = [1, 1, 1]} : vector<4x16x16xf32> to vector<4x1x16xf32>
    %27 = vector.extract_strided_slice %25 {offsets = [0, 0, 0], sizes = [4, 15, 16], strides = [1, 1, 1]} : vector<4x16x16xf32> to vector<4x15x16xf32>
    %28 = tpu.concatenate %26, %27 in 1 : vector<4x1x16xf32>, vector<4x15x16xf32> -> vector<4x16x16xf32>
    %29 = vector.extract_strided_slice %25 {offsets = [0, 1, 0], sizes = [4, 15, 16], strides = [1, 1, 1]} : vector<4x16x16xf32> to vector<4x15x16xf32>
    %30 = vector.extract_strided_slice %25 {offsets = [0, 14, 0], sizes = [4, 1, 16], strides = [1, 1, 1]} : vector<4x16x16xf32> to vector<4x1x16xf32>
    %31 = tpu.concatenate %29, %30 in 1 : vector<4x15x16xf32>, vector<4x1x16xf32> -> vector<4x16x16xf32>
    %32 = arith.addf %28, %25 : vector<4x16x16xf32>
    %33 = arith.addf %32, %31 : vector<4x16x16xf32>
    %34 = arith.mulf %0, %0 : vector<4x16x16xf32>
    %35 = vector.extract_strided_slice %34 {offsets = [0, 0, 1], sizes = [4, 16, 1], strides = [1, 1, 1]} : vector<4x16x16xf32> to vector<4x16x1xf32>
    %36 = vector.extract_strided_slice %34 {offsets = [0, 0, 0], sizes = [4, 16, 15], strides = [1, 1, 1]} : vector<4x16x16xf32> to vector<4x16x15xf32>
    %37 = tpu.concatenate %35, %36 in 2 : vector<4x16x1xf32>, vector<4x16x15xf32> -> vector<4x16x16xf32>
    %38 = vector.extract_strided_slice %34 {offsets = [0, 0, 1], sizes = [4, 16, 15], strides = [1, 1, 1]} : vector<4x16x16xf32> to vector<4x16x15xf32>
    %39 = vector.extract_strided_slice %34 {offsets = [0, 0, 14], sizes = [4, 16, 1], strides = [1, 1, 1]} : vector<4x16x16xf32> to vector<4x16x1xf32>
    %40 = tpu.concatenate %38, %39 in 2 : vector<4x16x15xf32>, vector<4x16x1xf32> -> vector<4x16x16xf32>
    %41 = arith.addf %37, %34 : vector<4x16x16xf32>
    %42 = arith.addf %41, %40 : vector<4x16x16xf32>
    %43 = vector.extract_strided_slice %42 {offsets = [0, 1, 0], sizes = [4, 1, 16], strides = [1, 1, 1]} : vector<4x16x16xf32> to vector<4x1x16xf32>
    %44 = vector.extract_strided_slice %42 {offsets = [0, 0, 0], sizes = [4, 15, 16], strides = [1, 1, 1]} : vector<4x16x16xf32> to vector<4x15x16xf32>
    %45 = tpu.concatenate %43, %44 in 1 : vector<4x1x16xf32>, vector<4x15x16xf32> -> vector<4x16x16xf32>
    %46 = vector.extract_strided_slice %42 {offsets = [0, 1, 0], sizes = [4, 15, 16], strides = [1, 1, 1]} : vector<4x16x16xf32> to vector<4x15x16xf32>
    %47 = vector.extract_strided_slice %42 {offsets = [0, 14, 0], sizes = [4, 1, 16], strides = [1, 1, 1]} : vector<4x16x16xf32> to vector<4x1x16xf32>
    %48 = tpu.concatenate %46, %47 in 1 : vector<4x15x16xf32>, vector<4x1x16xf32> -> vector<4x16x16xf32>
    %49 = arith.addf %45, %42 : vector<4x16x16xf32>
    %50 = arith.addf %49, %48 : vector<4x16x16xf32>
    %51 = arith.mulf %1, %1 : vector<4x16x16xf32>
    %52 = vector.extract_strided_slice %51 {offsets = [0, 0, 1], sizes = [4, 16, 1], strides = [1, 1, 1]} : vector<4x16x16xf32> to vector<4x16x1xf32>
    %53 = vector.extract_strided_slice %51 {offsets = [0, 0, 0], sizes = [4, 16, 15], strides = [1, 1, 1]} : vector<4x16x16xf32> to vector<4x16x15xf32>
    %54 = tpu.concatenate %52, %53 in 2 : vector<4x16x1xf32>, vector<4x16x15xf32> -> vector<4x16x16xf32>
    %55 = vector.extract_strided_slice %51 {offsets = [0, 0, 1], sizes = [4, 16, 15], strides = [1, 1, 1]} : vector<4x16x16xf32> to vector<4x16x15xf32>
    %56 = vector.extract_strided_slice %51 {offsets = [0, 0, 14], sizes = [4, 16, 1], strides = [1, 1, 1]} : vector<4x16x16xf32> to vector<4x16x1xf32>
    %57 = tpu.concatenate %55, %56 in 2 : vector<4x16x15xf32>, vector<4x16x1xf32> -> vector<4x16x16xf32>
    %58 = arith.addf %54, %51 : vector<4x16x16xf32>
    %59 = arith.addf %58, %57 : vector<4x16x16xf32>
    %60 = vector.extract_strided_slice %59 {offsets = [0, 1, 0], sizes = [4, 1, 16], strides = [1, 1, 1]} : vector<4x16x16xf32> to vector<4x1x16xf32>
    %61 = vector.extract_strided_slice %59 {offsets = [0, 0, 0], sizes = [4, 15, 16], strides = [1, 1, 1]} : vector<4x16x16xf32> to vector<4x15x16xf32>
    %62 = tpu.concatenate %60, %61 in 1 : vector<4x1x16xf32>, vector<4x15x16xf32> -> vector<4x16x16xf32>
    %63 = vector.extract_strided_slice %59 {offsets = [0, 1, 0], sizes = [4, 15, 16], strides = [1, 1, 1]} : vector<4x16x16xf32> to vector<4x15x16xf32>
    %64 = vector.extract_strided_slice %59 {offsets = [0, 14, 0], sizes = [4, 1, 16], strides = [1, 1, 1]} : vector<4x16x16xf32> to vector<4x1x16xf32>
    %65 = tpu.concatenate %63, %64 in 1 : vector<4x15x16xf32>, vector<4x1x16xf32> -> vector<4x16x16xf32>
    %66 = arith.addf %62, %59 : vector<4x16x16xf32>
    %67 = arith.addf %66, %65 : vector<4x16x16xf32>
    %68 = arith.mulf %0, %1 : vector<4x16x16xf32>
    %69 = vector.extract_strided_slice %68 {offsets = [0, 0, 1], sizes = [4, 16, 1], strides = [1, 1, 1]} : vector<4x16x16xf32> to vector<4x16x1xf32>
    %70 = vector.extract_strided_slice %68 {offsets = [0, 0, 0], sizes = [4, 16, 15], strides = [1, 1, 1]} : vector<4x16x16xf32> to vector<4x16x15xf32>
    %71 = tpu.concatenate %69, %70 in 2 : vector<4x16x1xf32>, vector<4x16x15xf32> -> vector<4x16x16xf32>
    %72 = vector.extract_strided_slice %68 {offsets = [0, 0, 1], sizes = [4, 16, 15], strides = [1, 1, 1]} : vector<4x16x16xf32> to vector<4x16x15xf32>
    %73 = vector.extract_strided_slice %68 {offsets = [0, 0, 14], sizes = [4, 16, 1], strides = [1, 1, 1]} : vector<4x16x16xf32> to vector<4x16x1xf32>
    %74 = tpu.concatenate %72, %73 in 2 : vector<4x16x15xf32>, vector<4x16x1xf32> -> vector<4x16x16xf32>
    %75 = arith.addf %71, %68 : vector<4x16x16xf32>
    %76 = arith.addf %75, %74 : vector<4x16x16xf32>
    %77 = vector.extract_strided_slice %76 {offsets = [0, 1, 0], sizes = [4, 1, 16], strides = [1, 1, 1]} : vector<4x16x16xf32> to vector<4x1x16xf32>
    %78 = vector.extract_strided_slice %76 {offsets = [0, 0, 0], sizes = [4, 15, 16], strides = [1, 1, 1]} : vector<4x16x16xf32> to vector<4x15x16xf32>
    %79 = tpu.concatenate %77, %78 in 1 : vector<4x1x16xf32>, vector<4x15x16xf32> -> vector<4x16x16xf32>
    %80 = vector.extract_strided_slice %76 {offsets = [0, 1, 0], sizes = [4, 15, 16], strides = [1, 1, 1]} : vector<4x16x16xf32> to vector<4x15x16xf32>
    %81 = vector.extract_strided_slice %76 {offsets = [0, 14, 0], sizes = [4, 1, 16], strides = [1, 1, 1]} : vector<4x16x16xf32> to vector<4x1x16xf32>
    %82 = tpu.concatenate %80, %81 in 1 : vector<4x15x16xf32>, vector<4x1x16xf32> -> vector<4x16x16xf32>
    %83 = arith.addf %79, %76 : vector<4x16x16xf32>
    %84 = arith.addf %83, %82 : vector<4x16x16xf32>
    %85 = arith.mulf %17, %33 : vector<4x16x16xf32>
    %86 = arith.mulf %17, %17 : vector<4x16x16xf32>
    %87 = arith.mulf %33, %33 : vector<4x16x16xf32>
    %cst = arith.constant 2.000000e+00 : f32
    %88 = vector.broadcast %cst : f32 to vector<4x16x16xf32>
    %89 = arith.mulf %88, %85 : vector<4x16x16xf32>
    %cst_5 = arith.constant 8.100000e-03 : f32
    %90 = vector.broadcast %cst_5 : f32 to vector<4x16x16xf32>
    %91 = arith.addf %89, %90 : vector<4x16x16xf32>
    %cst_6 = arith.constant 9.000000e+00 : f32
    %92 = vector.broadcast %cst_6 : f32 to vector<4x16x16xf32>
    %93 = arith.mulf %92, %84 : vector<4x16x16xf32>
    %94 = arith.subf %93, %85 : vector<4x16x16xf32>
    %cst_7 = arith.constant 2.000000e+00 : f32
    %95 = vector.broadcast %cst_7 : f32 to vector<4x16x16xf32>
    %96 = arith.mulf %95, %94 : vector<4x16x16xf32>
    %cst_8 = arith.constant 7.290000e-02 : f32
    %97 = vector.broadcast %cst_8 : f32 to vector<4x16x16xf32>
    %98 = arith.addf %96, %97 : vector<4x16x16xf32>
    %99 = arith.mulf %91, %98 : vector<4x16x16xf32>
    %100 = arith.addf %86, %87 : vector<4x16x16xf32>
    %cst_9 = arith.constant 8.100000e-03 : f32
    %101 = vector.broadcast %cst_9 : f32 to vector<4x16x16xf32>
    %102 = arith.addf %100, %101 : vector<4x16x16xf32>
    %103 = arith.addf %50, %67 : vector<4x16x16xf32>
    %cst_10 = arith.constant 9.000000e+00 : f32
    %104 = vector.broadcast %cst_10 : f32 to vector<4x16x16xf32>
    %105 = arith.mulf %104, %103 : vector<4x16x16xf32>
    %106 = arith.subf %105, %86 : vector<4x16x16xf32>
    %107 = arith.subf %106, %87 : vector<4x16x16xf32>
    %cst_11 = arith.constant 7.290000e-02 : f32
    %108 = vector.broadcast %cst_11 : f32 to vector<4x16x16xf32>
    %109 = arith.addf %107, %108 : vector<4x16x16xf32>
    %110 = arith.mulf %102, %109 : vector<4x16x16xf32>
    %111 = tpu.reciprocal %110 : vector<4x16x16xf32> -> vector<4x16x16xf32>
    %112 = arith.mulf %99, %111 : vector<4x16x16xf32>
    %cst_12 = arith.constant 1.000000e+00 : f32
    %113 = vector.broadcast %cst_12 : f32 to vector<4x16x16xf32>
    %114 = arith.subf %113, %112 : vector<4x16x16xf32>
    %cst_13 = arith.constant 5.000000e-01 : f32
    %115 = vector.broadcast %cst_13 : f32 to vector<4x16x16xf32>
    %116 = arith.mulf %114, %115 : vector<4x16x16xf32>
    %cst_14 = arith.constant 0.000000e+00 : f32
    %cst_15 = arith.constant 1.000000e+00 : f32
    %117 = vector.broadcast %cst_14 : f32 to vector<4x16x16xf32>
    %118 = arith.maximumf %117, %116 : vector<4x16x16xf32>
    %119 = vector.broadcast %cst_15 : f32 to vector<4x16x16xf32>
    %120 = arith.minimumf %119, %118 : vector<4x16x16xf32>
    %c0_16 = arith.constant 0 : index
    %c0_17 = arith.constant 0 : index
    %c0_18 = arith.constant 0 : index
    %121 = vector.load %arg3[%c0_16, %c0_17, %c0_18] : memref<4x16x16xf32, #tpu.memory_space<vmem>>, vector<4x16x16xf32>
    tpu.vector_store %arg3[%c0_16, %c0_17, %c0_18], %120 {strides = array<i32>} : memref<4x16x16xf32, #tpu.memory_space<vmem>>, vector<4x16x16xf32>,
    return
  }
  func.func @transform_0(%arg0: i32) -> (i32, i32, i32) {
    %c0_i32 = arith.constant 0 : i32
    %c0_i32_0 = arith.constant 0 : i32
    %c0_i32_1 = arith.constant 0 : i32
    return %arg0, %c0_i32, %c0_i32_0 : i32, i32, i32
  }
  func.func @transform_1(%arg0: i32) -> (i32, i32, i32) {
    %c0_i32 = arith.constant 0 : i32
    %c0_i32_0 = arith.constant 0 : i32
    %c0_i32_1 = arith.constant 0 : i32
    return %arg0, %c0_i32, %c0_i32_0 : i32, i32, i32
  }
  func.func @transform_2(%arg0: i32) -> (i32, i32, i32) {
    %c0_i32 = arith.constant 0 : i32
    %c0_i32_0 = arith.constant 0 : i32
    %c0_i32_1 = arith.constant 0 : i32
    return %arg0, %c0_i32, %c0_i32_0 : i32, i32, i32
  }
}

</mosaic_0001>

<bundles_post_ra>
// kernel: tpu_custom_call.1
= control target key start
LH: loop header
LB: loop body
LE: loop exit
PB: predicated region body
PF: predicated region fallthrough
CT: control target
= control target key end

     0   :  { %7 = vsyncpa [#allocation3], 0  ;;  %s2724_s0 = inlined_call_operand.hbm [shape: f32[8,16,16], index: 0, kind: input, shape index: {}]   ;;  %s2725_s1 = inlined_call_operand.hbm [shape: f32[8,16,16], index: 1, kind: input, shape index: {}]   ;;  %s2726_s2 = inlined_call_operand.hbm [shape: f32[8,16,16], index: 2, kind: output, shape index: {}]  }
   0x1   :  { %9 = vsyncpa [#allocation3 + $0x1], 0 }
   0x2   :  { %10 = vsyncpa [#allocation6], 0 }
   0x3   :  { %12 = vsyncpa [#allocation6 + $0x1], 0 }
   0x4   :  { %13 = vsyncpa [#allocation4], 0 }
   0x5   :  { %15 = vsyncpa [#allocation4 + $0x1], 0  ;;  %s1659_s9 = smov 0   ;;  %s1661_s10 = smov 0  }
   0x6   :  { %s1663_s11 = smov 0   ;;  %s1665_s12 = smov 0  }
   0x7 LB: > { %s1680_s13 = sadd.s32 4294967295, %s1633_s12   ;;  %s1403_s14 = sadd.s32 4294967294, %s1633_s12   ;;  %s1633_s12 = sphi %s1665_s12, %s2802_s12   ;;  %s1629_s11 = sphi %s1663_s11, %s2801_s11   ;;  %s1625_s10 = sphi %s1661_s10, %s2800_s10   ;;  %s1621_s9 = sphi %s1659_s9, %s2799_s9  }
   0x8   : > { %s1684_s15 = sadd.s32 1, %s1633_s12   ;;  %s28_s16 = sadd.s32 1, %s1629_s11 }
   0x9   : > { %s25_s17 = ssub.s32 %s1633_s12, %s1684_s15  ;;  %p35_p0 = scmp.ne.s32.totalorder %s1629_s11, %s1625_s10 }
   0xa   : > { %p26_p1 = scmp.eq.s32.totalorder %s25_s17, 0  ;;  %p36_p2 = scmp.eq.s32.totalorder %s1633_s12, 0 }
   0xb   : > { %p41_p3 = scmp.ne.s32.totalorder %s1625_s10, %s1621_s9  ;;  %p42_p4 = scmp.eq.s32.totalorder %s1680_s13, 0 }
   0xc   : > { %s1696_s18 = scalar_select %p26_p1, %s1629_s11, %s28_s16  }
   0xd   : > { %p1698_p5 = por %p36_p2, %p35_p0  ;;  %p1702_p6 = por %p42_p4, %p41_p3 }
   0xe   : > { %p91_p7 = scmp.eq.s32.totalorder %s1680_s13, 1  ;;  %p97_p8 = scmp.eq.s32.totalorder %s1403_s14, 1 }
   0xf   : > { %s2750_s20 = scalar_select %p1702_p6, 1, 0 }
  0x10   : > { %p1447_p10 = scmp.lt.s32.totalorder %s1633_s12, 2  ;;  %p1709_p11 = por %p91_p7, %p35_p0 }
  0x11   : > { %p1713_p12 = por %p97_p8, %p41_p3  ;;  %s1718_s23 = sand.u32 1, %s1629_s11  }
  0x12   : > { %s2751_s21 = scalar_select %p1709_p11, 1, 0 }
  0x13   : > { %s2752_s22 = scalar_select %p1713_p12, 1, 0 }
  0x14   : > { %s1425_s24 = sshll.u32 %s1633_s12, 10  ;;  %s1406_s25 = sshll.u32 %s1718_s23, 6 }
  0x15   : > { %s1727_s28 = scalar_lea.hbm %s2724_s0, %s1425_s24  ;;  %s121_s29 = scalar_lea.vmem [#allocation2], %s1406_s25 }
  0x16   : > { %s129_s30 = sshll.u32 %s121_s29, 4  ;;  %p1733_p13 = pnand %p1447_p10, %p1698_p5  ;;  %s1737_s30 = int_to_ptr.vmem [resolvable:$true] %s129_s30 }
  0x17   : > { %s118_s4 = scalar_lea.sflag [#allocation3], %s1718_s23  ;;  %s1503_s5 = scalar_lea.hbm %s1727_s28, 1024 }
  0x18   : > { %p1504_p0 = scmp.ne.s32.totalorder %s1727_s28, %s1503_s5  ;;  %p1505_p1 = pneg %p1733_p13 }
  0x19   : > { %s1508_s8 = scalar_lea.hbm %s2724_s0, 2048  ;;  %p1509_p4 = scmp.lt.u32.totalorder %s1727_s28, %s2724_s0 }
  0x1a   : > { %p1506_p2 = pnand %p1505_p1, %p1504_p0  ;;  %p1510_p5 = scmp.lt.u32.totalorder %s1508_s8, %s1503_s5 }
  0x1b   : > { %p1512_p8 = scmp.lt.u32.totalorder %s1503_s5, %s1727_s28 }
  0x1c   : > { %p1507_p3 = pneg %p1506_p2  ;;  %p1511_p7 = por %p1510_p5, %p1509_p4 }
  0x1e   : > { %p1513_p10 = por %p1512_p8, %p1511_p7 }
  0x20   : > { %p1514_p9 = pnand %p1513_p10, %p1507_p3 }
  0x22   : > { %1517 = shalt.err (!%p1514_p9)
}
  0x23   : > { %s1518_s17 = scalar_lea.vmem %s1737_s30, 1024  ;;  %s1635_s19 = smov [#allocation2]  }
  0x24   : > { %p1519_p0 = scmp.ne.s32.totalorder %s1737_s30, %s1518_s17  ;;  %s1523_s26 = sshll.u32 %s1635_s19, 4  ;;  %s1524_s26 = int_to_ptr.vmem [resolvable:$false] %s1523_s26 }
  0x25   : > { %s1525_s27 = scalar_lea.vmem %s1524_s26, 2048  ;;  %p1526_p11 = scmp.lt.s32.totalorder %s1737_s30, %s1524_s26 }
  0x26   : > { %p1521_p2 = pnand %p1519_p0, %p1505_p1  ;;  %p1527_p4 = scmp.lt.s32.totalorder %s1525_s27, %s1518_s17 }
  0x28   : > { %p1522_p12 = pneg %p1521_p2  ;;  %p1528_p5 = por %p1527_p4, %p1526_p11 }
  0x2a   : > { %p1529_p7 = pnand %p1528_p5, %p1522_p12 }
  0x2c   : > { %1532 = shalt.err (!%p1529_p7)
}
  0x2d   : > { %s1636_s29 = smov 128   ;;  %s1637_s5 = smov 8  }
  0x2e   : > { %1439 = dma.hbm_to_vmem [thread:$0]  (!%p1733_p13), %s1727_s28, 1024, %s1737_s30, %s118_s4, %s1636_s29, %s1636_s29, %s1637_s5  }
  0x2f   : > { %p1414_p9 = scmp.ge.s32.totalorder %s1633_s12, 1  ;;  %p159_p11 = scmp.lt.s32.totalorder %s1633_s12, 3 }
  0x30   : > { %s1781_s14 = scalar_lea.hbm %s2725_s1, %s1425_s24  ;;  %s143_s16 = scalar_lea.vmem [#allocation5], %s1406_s25 }
  0x31   : > { %p1772_p12 = pnand %p1414_p9, %p159_p11  ;;  %s151_s17 = sshll.u32 %s143_s16, 4  ;;  %s1785_s17 = int_to_ptr.vmem [resolvable:$true] %s151_s17 }
  0x32   : > { %s140_s28 = scalar_lea.sflag [#allocation6], %s1718_s23  ;;  %s1533_s30 = scalar_lea.hbm %s1781_s14, 1024 }
  0x33   : > { %p1534_p3 = scmp.ne.s32.totalorder %s1781_s14, %s1533_s30  ;;  %s1538_s24 = scalar_lea.hbm %s2725_s1, 2048 }
  0x34   : > { %p1539_p0 = scmp.lt.u32.totalorder %s1781_s14, %s2725_s1  ;;  %p1540_p2 = scmp.lt.u32.totalorder %s1538_s24, %s1533_s30 }
  0x35   : > { %p1536_p8 = pnand %p1534_p3, %p1505_p1  ;;  %p1542_p5 = scmp.lt.u32.totalorder %s1533_s30, %s1781_s14 }
  0x36   : > { %p1541_p4 = por %p1540_p2, %p1539_p0 }
  0x37   : > { %p1537_p10 = pneg %p1536_p8 }
  0x38   : > { %p1543_p7 = por %p1542_p5, %p1541_p4 }
  0x3a   : > { %p1544_p9 = pnand %p1543_p7, %p1537_p10 }
  0x3c   : > { %1547 = shalt.err (!%p1544_p9)
}
  0x3d   : > { %s1548_s25 = scalar_lea.vmem %s1785_s17, 1024  ;;  %s1638_s7 = smov [#allocation5]  }
  0x3e   : > { %p1549_p11 = scmp.ne.s32.totalorder %s1785_s17, %s1548_s25  ;;  %s1553_s8 = sshll.u32 %s1638_s7, 4  ;;  %s1554_s8 = int_to_ptr.vmem [resolvable:$false] %s1553_s8 }
  0x3f   : > { %s1555_s16 = scalar_lea.vmem %s1554_s8, 2048  ;;  %p1556_p6 = scmp.lt.s32.totalorder %s1785_s17, %s1554_s8 }
  0x40   : > { %p1551_p3 = pnand %p1549_p11, %p1505_p1  ;;  %p1557_p0 = scmp.lt.s32.totalorder %s1555_s16, %s1548_s25 }
  0x42   : > { %p1552_p8 = pneg %p1551_p3  ;;  %p1558_p2 = por %p1557_p0, %p1556_p6 }
  0x44   : > { %p1559_p4 = pnand %p1558_p2, %p1552_p8 }
  0x46   : > { %1562 = shalt.err (!%p1559_p4)
}
  0x47   : > { %1442 = dma.hbm_to_vmem [thread:$0]  (!%p1733_p13), %s1781_s14, 1024, %s1785_s17, %s140_s28, %s1636_s29, %s1636_s29, %s1637_s5  }
  0x48   : > { %163 = sbr.rel (%p1772_p12) target bundleno = 428 (0x1ac), region = 28 }
  0x4f   : > { %s1819_s30 = sand.u32 1, %s1625_s10   ;;  %p2755_p6 = scmp.ne.s32.totalorder %s2750_s20, 0 }
  0x50   : > { %s1822_s4 = sshll.u32 %s1819_s30, 6  ;;  %s166_s3 = scalar_lea.sflag [#allocation3], %s1819_s30 }
  0x51   : > { %s169_s19 = scalar_lea.vmem [#allocation2], %s1822_s4 }
  0x52   : > { %1608 = dma.done.wait (%p2755_p6), %s166_s3, 1024  }
  0x53   : > { %1610 = vsyncadd (%p2755_p6), %s166_s3, 4294966272  ;;  %s175_s23 = scalar_lea.sflag [#allocation6], %s1819_s30  ;;  %s1832_s29 = scalar_lea.vmem [#allocation5], %s1822_s4 }
  0x54   : > { %1612 = dma.done.wait (%p2755_p6), %s175_s23, 1024  }
  0x55   : > { %1614 = vsyncadd (%p2755_p6), %s175_s23, 4294966272  ;;  %v1838_v0 = vld [vmem:[%s169_s19 + $0x10] sm:$0xff]  ;;  %v1840_v1 = vld [vmem:[%s169_s19] sm:$0xff]  ;;  %s1639_s5 = smov 127   ;;  %s1640_s20 = smov 1   ;;  %vm279_vm0 = vcmask 7168  }
  0x56   : > { %235 = vrot.lane.b32.xlu1 %v1838_v0, %s1639_s5  ;;  %231 = vrot.lane.b32.xlu0 %v1840_v1, %s1639_s5  ;;  %v1846_v2 = vld [vmem:[%s169_s19 + $0x18] sm:$0xff]  ;;  %v1848_v3 = vld [vmem:[%s169_s19 + $0x8] sm:$0xff]  ;;  %v1940_v17 = vmul.f32 %v1840_v1, %v1840_v1  ;;  %v1952_v19 = vmul.f32 %v1838_v0, %v1838_v0  ;;  %vm288_vm1 = vcmask 121856   ;;  %vm354_vm2 = vcmask 1046528   ;;  %s2648_s6 = scalar_lea.vmem [#allocation7], %s1822_s4  ;;  %s1429_s14 = sshll.u32 %s1680_s13, 10 }
  0x57   : > { %v1854_v4 = vld [vmem:[%s169_s19 + $0x28] sm:$0xff]  ;;  %v1856_v5 = vld [vmem:[%s169_s19 + $0x20] sm:$0xff]  ;;  %v1862_v6 = vld [vmem:[%s169_s19 + $0x38] sm:$0xff]  ;;  %v1936_v16 = vmul.f32 %v1848_v3, %v1848_v3  ;;  %v1948_v18 = vmul.f32 %v1846_v2, %v1846_v2  ;;  %vm329_vm3 = vcmask 1040384   ;;  %vm1283_vm4 = vcmask 130048   ;;  %s1307_s17 = sshll.u32 %s2648_s6, 4  ;;  %s2674_s26 = scalar_lea.hbm %s2726_s2, %s1429_s14  ;;  %s2676_s17 = int_to_ptr.vmem [resolvable:$true] %s1307_s17 }
  0x58   : > { %v1864_v7 = vld [vmem:[%s169_s19 + $0x30] sm:$0xff]  ;;  %v1887_v8 = vld [vmem:[%s1832_s29 + $0x8] sm:$0xff]  ;;  %v1890_v9 = vld [vmem:[%s1832_s29] sm:$0xff]  ;;  %v1960_v20 = vmul.f32 %v1854_v4, %v1854_v4  ;;  %v1964_v21 = vmul.f32 %v1856_v5, %v1856_v5  ;;  %v1972_v22 = vmul.f32 %v1862_v6, %v1862_v6  ;;  %s1293_s27 = scalar_lea.sflag [#allocation4], %s1819_s30  ;;  %s1563_s13 = scalar_lea.vmem %s2676_s17, 1024 }
  0x59   : > { %v1897_v10 = vld [vmem:[%s1832_s29 + $0x18] sm:$0xff]  ;;  %v1900_v11 = vld [vmem:[%s1832_s29 + $0x10] sm:$0xff]  ;;  %v1907_v12 = vld [vmem:[%s1832_s29 + $0x28] sm:$0xff]  ;;  %v1976_v23 = vmul.f32 %v1864_v7, %v1864_v7  ;;  %v2000_v24 = vmul.f32 %v1887_v8, %v1887_v8  ;;  %v2004_v25 = vmul.f32 %v1890_v9, %v1890_v9  ;;  %v2072_v38 = vmul.f32 %v1887_v8, %v1848_v3  ;;  %p1564_p13 = scmp.ne.s32.totalorder %s2676_s17, %s1563_s13  ;;  %p2796_p1 = scmp.ne.s32.totalorder %s2751_s21, 0 }
  0x5a   : > { %237 = vrot.lane.b32.xlu1 %v1846_v2, %s1639_s5  ;;  %233 = vrot.lane.b32.xlu0 %v1848_v3, %s1639_s5  ;;  %v1910_v13 = vld [vmem:[%s1832_s29 + $0x20] sm:$0xff]  ;;  %v1917_v14 = vld [vmem:[%s1832_s29 + $0x38] sm:$0xff]  ;;  %v2012_v26 = vmul.f32 %v1897_v10, %v1897_v10  ;;  %v2016_v27 = vmul.f32 %v1900_v11, %v1900_v11  ;;  %v2024_v28 = vmul.f32 %v1907_v12, %v1907_v12  ;;  %s1641_s25 = smov [#allocation7]  }
  0x5b   : > { %2756 = vst [vmem:[#allocation11_spill] sm:$0xff] %v1917_v14  ;;  %v1920_v15 = vld [vmem:[%s1832_s29 + $0x30] sm:$0xff]  ;;  %v2028_v29 = vmul.f32 %v1910_v13, %v1910_v13  ;;  %v2036_v30 = vmul.f32 %v1917_v14, %v1917_v14  ;;  %2758 = vst [vmem:[#allocation13_spill] sm:$0xff] %v2072_v38  ;;  %v2076_v39 = vmul.f32 %v1890_v9, %v1840_v1  ;;  %p1565_p12 = pnand %p1564_p13, %p2796_p1  ;;  %s1567_s7 = sshll.u32 %s1641_s25, 4  ;;  %s1568_s7 = int_to_ptr.vmem [resolvable:$false] %s1567_s7 }
  0x5c   : > { %2757 = vst [vmem:[#allocation12_spill] sm:$0xff] %v1920_v15  ;;  %v2040_v31 = vmul.f32 %v1920_v15, %v1920_v15  ;;  %v2088_v42 = vmul.f32 %v1897_v10, %v1846_v2  ;;  %v2092_v43 = vmul.f32 %v1900_v11, %v1838_v0  ;;  %v2096_v46 = vmul.f32 %v1907_v12, %v1854_v4  ;;  %s1569_s8 = scalar_lea.vmem %s1568_s7, 2048  ;;  %p1570_p5 = scmp.lt.s32.totalorder %s2676_s17, %s1568_s7 }
  0x5d   : > { %2759 = vst [vmem:[#allocation14_spill] sm:$0xff] %v2076_v39  ;;  %v2110_v53 = vmul.f32 %v1910_v13, %v1856_v5  ;;  %v2114_v58 = vmul.f32 %v1917_v14, %v1862_v6  ;;  %p1566_p10 = pneg %p1565_p12  ;;  %p1571_p7 = scmp.lt.s32.totalorder %s1569_s8, %s1563_s13 }
  0x5e   : > { %241 = vrot.lane.b32.xlu1 %v1854_v4, %s1639_s5  ;;  %239 = vrot.lane.b32.xlu0 %v1856_v5, %s1639_s5  ;;  %2760 = vst [vmem:[#allocation15_spill] sm:$0xff] %v2088_v42  ;;  %2761 = vst [vmem:[#allocation16_spill] sm:$0xff] %v2092_v43 }
  0x5f   : > { %2762 = vst [vmem:[#allocation17_spill] sm:$0xff] %v2096_v46  ;;  %2763 = vst [vmem:[#allocation18_spill] sm:$0xff] %v2110_v53  ;;  %p1572_p9 = por %p1571_p7, %p1570_p5 }
  0x60   : > { %2764 = vst [vmem:[#allocation19_spill] sm:$0xff] %v2114_v58 }
  0x61   : > { %p1573_p11 = pnand %p1572_p9, %p1566_p10 }
  0x62   : > { %245 = vrot.lane.b32.xlu1 %v1862_v6, %s1639_s5  ;;  %243 = vrot.lane.b32.xlu0 %v1864_v7, %s1639_s5 }
  0x66   : > { %257 = vrot.lane.b32.xlu1 %v1848_v3, %s1640_s20  ;;  %255 = vrot.lane.b32.xlu0 %v1840_v1, %s1640_s20 }
  0x6a   : > { %261 = vrot.lane.b32.xlu1 %v1846_v2, %s1640_s20  ;;  %259 = vrot.lane.b32.xlu0 %v1838_v0, %s1640_s20 }
  0x6e   : > { %265 = vrot.lane.b32.xlu1 %v1854_v4, %s1640_s20  ;;  %263 = vrot.lane.b32.xlu0 %v1856_v5, %s1640_s20 }
  0x72   : > { %269 = vrot.lane.b32.xlu1 %v1862_v6, %s1640_s20  ;;  %267 = vrot.lane.b32.xlu0 %v1864_v7, %s1640_s20 }
  0x76   : > { %405 = vrot.lane.b32.xlu1 %v1887_v8, %s1639_s5  ;;  %403 = vrot.lane.b32.xlu0 %v1890_v9, %s1639_s5 }
  0x7a   : > { %409 = vrot.lane.b32.xlu1 %v1897_v10, %s1639_s5  ;;  %407 = vrot.lane.b32.xlu0 %v1900_v11, %s1639_s5 }
  0x7e   : > { %413 = vrot.lane.b32.xlu1 %v1907_v12, %s1639_s5  ;;  %411 = vrot.lane.b32.xlu0 %v1910_v13, %s1639_s5 }
  0x82   : > { %417 = vrot.lane.b32.xlu1 %v1917_v14, %s1639_s5  ;;  %415 = vrot.lane.b32.xlu0 %v1920_v15, %s1639_s5 }
  0x86   : > { %429 = vrot.lane.b32.xlu1 %v1887_v8, %s1640_s20  ;;  %427 = vrot.lane.b32.xlu0 %v1890_v9, %s1640_s20 }
  0x8a   : > { %433 = vrot.lane.b32.xlu1 %v1897_v10, %s1640_s20  ;;  %431 = vrot.lane.b32.xlu0 %v1900_v11, %s1640_s20 }
  0x8e   : > { %581 = vrot.lane.b32.xlu1 %v1936_v16, %s1639_s5  ;;  %579 = vrot.lane.b32.xlu0 %v1940_v17, %s1639_s5 }
  0x92   : > { %585 = vrot.lane.b32.xlu1 %v1948_v18, %s1639_s5  ;;  %583 = vrot.lane.b32.xlu0 %v1952_v19, %s1639_s5 }
  0x96   : > { %589 = vrot.lane.b32.xlu1 %v1960_v20, %s1639_s5  ;;  %587 = vrot.lane.b32.xlu0 %v1964_v21, %s1639_s5 }
  0x9a   : > { %593 = vrot.lane.b32.xlu1 %v1972_v22, %s1639_s5  ;;  %591 = vrot.lane.b32.xlu0 %v1976_v23, %s1639_s5 }
  0x9e   : > { %605 = vrot.lane.b32.xlu1 %v1936_v16, %s1640_s20  ;;  %603 = vrot.lane.b32.xlu0 %v1940_v17, %s1640_s20 }
  0xa2   : > { %609 = vrot.lane.b32.xlu1 %v1948_v18, %s1640_s20  ;;  %607 = vrot.lane.b32.xlu0 %v1952_v19, %s1640_s20 }
  0xa6   : > { %613 = vrot.lane.b32.xlu1 %v1960_v20, %s1640_s20  ;;  %611 = vrot.lane.b32.xlu0 %v1964_v21, %s1640_s20 }
  0xaa   : > { %617 = vrot.lane.b32.xlu1 %v1972_v22, %s1640_s20  ;;  %615 = vrot.lane.b32.xlu0 %v1976_v23, %s1640_s20 }
  0xae   : > { %757 = vrot.lane.b32.xlu1 %v2000_v24, %s1639_s5  ;;  %755 = vrot.lane.b32.xlu0 %v2004_v25, %s1639_s5 }
  0xb2   : > { %761 = vrot.lane.b32.xlu1 %v2012_v26, %s1639_s5  ;;  %759 = vrot.lane.b32.xlu0 %v2016_v27, %s1639_s5 }
  0xb6   : > { %765 = vrot.lane.b32.xlu1 %v2024_v28, %s1639_s5  ;;  %763 = vrot.lane.b32.xlu0 %v2028_v29, %s1639_s5 }
  0xba   : > { %769 = vrot.lane.b32.xlu1 %v2036_v30, %s1639_s5  ;;  %767 = vrot.lane.b32.xlu0 %v2040_v31, %s1639_s5 }
  0xbe   : > { %781 = vrot.lane.b32.xlu1 %v2000_v24, %s1640_s20  ;;  %779 = vrot.lane.b32.xlu0 %v2004_v25, %s1640_s20 }
  0xc2   : > { %785 = vrot.lane.b32.xlu1 %v2012_v26, %s1640_s20  ;;  %783 = vrot.lane.b32.xlu0 %v2016_v27, %s1640_s20 }
  0xc6   : > { %789 = vrot.lane.b32.xlu1 %v2024_v28, %s1640_s20  ;;  %787 = vrot.lane.b32.xlu0 %v2028_v29, %s1640_s20 }
  0xc8   : > { %v236_v32 = vpop.permute.xlu1 %235  ;;  %v232_v33 = vpop.permute.xlu0 %231 }
  0xca   : > { %793 = vrot.lane.b32.xlu1 %v2036_v30, %s1640_s20  ;;  %791 = vrot.lane.b32.xlu0 %v2040_v31, %s1640_s20 }
  0xcc   : > { %v238_v34 = vpop.permute.xlu1 %237  ;;  %v234_v35 = vpop.permute.xlu0 %233 }
  0xce   : > { %437 = vrot.lane.b32.xlu1 %v1907_v12, %s1640_s20  ;;  %435 = vrot.lane.b32.xlu0 %v1910_v13, %s1640_s20 }
  0xd0   : > { %v242_v36 = vpop.permute.xlu1 %241  ;;  %v240_v37 = vpop.permute.xlu0 %239 }
  0xd2   : > { %441 = vrot.lane.b32.xlu1 %v1917_v14, %s1640_s20  ;;  %439 = vrot.lane.b32.xlu0 %v1920_v15, %s1640_s20 }
  0xd4   : > { %v2078_v40 = vpop.permute.xlu1 %245  ;;  %v2080_v41 = vpop.permute.xlu0 %243 }
  0xd6   : > { %933 = vrot.lane.b32.xlu1 %v2072_v38, %s1639_s5  ;;  %931 = vrot.lane.b32.xlu0 %v2076_v39, %s1639_s5 }
  0xd8   : > { %v258_v44 = vpop.permute.xlu1 %257  ;;  %v256_v45 = vpop.permute.xlu0 %255 }
  0xd9   : > { %v281_v47 = vsel %vm279_vm0, %v234_v35, %v258_v44  ;;  %v290_v48 = vsel %vm288_vm1, %v234_v35, %v258_v44  ;;  %v280_v49 = vsel %vm279_vm0, %v232_v33, %v256_v45  ;;  %v289_v50 = vsel %vm288_vm1, %v232_v33, %v256_v45 }
  0xda   : > { %v298_v51 = vadd.f32 %v281_v47, %v1848_v3  ;;  %v297_v52 = vadd.f32 %v280_v49, %v1840_v1  ;;  %937 = vrot.lane.b32.xlu1 %v2088_v42, %s1639_s5  ;;  %935 = vrot.lane.b32.xlu0 %v2092_v43, %s1639_s5 }
  0xdc   : > { %v306_v54 = vadd.f32 %v298_v51, %v290_v48  ;;  %v305_v55 = vadd.f32 %v297_v52, %v289_v50  ;;  %v262_v56 = vpop.permute.xlu1 %261  ;;  %v260_v57 = vpop.permute.xlu0 %259 }
  0xdd   : > { %v283_v59 = vsel %vm279_vm0, %v238_v34, %v262_v56  ;;  %v292_v60 = vsel %vm288_vm1, %v238_v34, %v262_v56  ;;  %v282_v61 = vsel %vm279_vm0, %v236_v32, %v260_v57  ;;  %v291_v62 = vsel %vm288_vm1, %v236_v32, %v260_v57 }
  0xde   : > { %v331_v63 = vrot.slane %v306_v54, 7  ;;  %v355_v1 = vrot.slane %v306_v54, 1  ;;  %v317_v3 = vrot.slane %v305_v55, 1  ;;  %v330_v33 = vrot.slane %v305_v55, 7  ;;  %941 = vrot.lane.b32.xlu1 %v2096_v46, %s1639_s5  ;;  %939 = vrot.lane.b32.xlu0 %v2110_v53, %s1639_s5 }
  0xdf   : > { %v300_v35 = vadd.f32 %v283_v59, %v1846_v2  ;;  %v299_v44 = vadd.f32 %v282_v61, %v1838_v0  ;;  %v2128_v34 = vmul.f32 %v1920_v15, %v1864_v7 }
  0xe0   : > { %v375_v32 = vsel %vm354_vm2, %v355_v1, %v331_v63  ;;  %v332_v45 = vsel %vm329_vm3, %v330_v33, %v331_v63  ;;  %v350_v47 = vsel %vm329_vm3, %v317_v3, %v330_v33  ;;  %v356_v48 = vsel %vm354_vm2, %v317_v3, %v355_v1  ;;  %v266_v49 = vpop.permute.xlu1 %265  ;;  %v264_v50 = vpop.permute.xlu0 %263 }
  0xe1   : > { %2765 = vst [vmem:[#allocation20_spill] sm:$0xff] %v2128_v34  ;;  %v379_v51 = vadd.f32 %v350_v47, %v305_v55  ;;  %v380_v52 = vadd.f32 %v332_v45, %v306_v54  ;;  %v308_v56 = vadd.f32 %v300_v35, %v292_v60  ;;  %v307_v2 = vadd.f32 %v299_v44, %v291_v62 }
  0xe2   : > { %v285_v0 = vsel %vm279_vm0, %v242_v36, %v266_v49  ;;  %v294_v57 = vsel %vm288_vm1, %v242_v36, %v266_v49  ;;  %v284_v59 = vsel %vm279_vm0, %v240_v37, %v264_v50  ;;  %v293_v61 = vsel %vm288_vm1, %v240_v37, %v264_v50  ;;  %945 = vrot.lane.b32.xlu1 %v2114_v58, %s1639_s5 }
  0xe3   : > { %v2140_v63 = vadd.f32 %v379_v51, %v356_v48  ;;  %v2142_v1 = vadd.f32 %v380_v52, %v375_v32  ;;  %v334_v3 = vrot.slane %v308_v56, 7  ;;  %v357_v55 = vrot.slane %v308_v56, 1  ;;  %943 = vrot.lane.b32.xlu0 %v2128_v34, %s1639_s5 }
  0xe4   : > { %v318_v54 = vrot.slane %v307_v2, 1  ;;  %v333_v60 = vrot.slane %v307_v2, 7  ;;  %v302_v36 = vadd.f32 %v285_v0, %v1854_v4  ;;  %v301_v62 = vadd.f32 %v284_v59, %v1856_v5  ;;  %v270_v33 = vpop.permute.xlu1 %269  ;;  %v268_v37 = vpop.permute.xlu0 %267 }
  0xe5   : > { %v376_v35 = vsel %vm354_vm2, %v357_v55, %v334_v3  ;;  %v287_v44 = vsel %vm279_vm0, %v2078_v40, %v270_v33  ;;  %v296_v50 = vsel %vm288_vm1, %v2078_v40, %v270_v33  ;;  %v286_v59 = vsel %vm279_vm0, %v2080_v41, %v268_v37 }
  0xe6   : > { %v335_v32 = vsel %vm329_vm3, %v333_v60, %v334_v3  ;;  %v351_v45 = vsel %vm329_vm3, %v318_v54, %v333_v60  ;;  %v358_v47 = vsel %vm354_vm2, %v318_v54, %v357_v55  ;;  %v310_v48 = vadd.f32 %v302_v36, %v294_v57  ;;  %957 = vrot.lane.b32.xlu1 %v2072_v38, %s1640_s20 }
  0xe7   : > { %v381_v4 = vadd.f32 %v351_v45, %v307_v2  ;;  %v382_v49 = vadd.f32 %v335_v32, %v308_v56  ;;  %v309_v5 = vadd.f32 %v301_v62, %v293_v61  ;;  %955 = vrot.lane.b32.xlu0 %v2076_v39, %s1640_s20  ;;  %v304_v0 = vadd.f32 %v287_v44, %v1862_v6 }
  0xe8   : > { %v337_v51 = vrot.slane %v310_v48, 7  ;;  %v359_v52 = vrot.slane %v310_v48, 1  ;;  %v406_v57 = vpop.permute.xlu1 %405  ;;  %v404_v3 = vpop.permute.xlu0 %403  ;;  %v295_v40 = vsel %vm288_vm1, %v2080_v41, %v268_v37  ;;  %v303_v60 = vadd.f32 %v286_v59, %v1864_v7 }
  0xe9   : > { %v2163_v55 = vadd.f32 %v381_v4, %v358_v47  ;;  %v2165_v2 = vadd.f32 %v382_v49, %v376_v35  ;;  %v319_v56 = vrot.slane %v309_v5, 1  ;;  %v336_v61 = vrot.slane %v309_v5, 7 }
  0xea   : > { %v312_v54 = vadd.f32 %v304_v0, %v296_v50  ;;  %961 = vrot.lane.b32.xlu1 %v2088_v42, %s1640_s20  ;;  %v377_v41 = vsel %vm354_vm2, %v359_v52, %v337_v51  ;;  %v311_v45 = vadd.f32 %v303_v60, %v295_v40 }
  0xeb   : > { %v338_v6 = vsel %vm329_vm3, %v336_v61, %v337_v51  ;;  %v352_v36 = vsel %vm329_vm3, %v319_v56, %v336_v61  ;;  %959 = vrot.lane.b32.xlu0 %v2092_v43, %s1640_s20  ;;  %v360_v62 = vsel %vm354_vm2, %v319_v56, %v359_v52 }
  0xec   : > { %v383_v33 = vadd.f32 %v352_v36, %v309_v5  ;;  %v384_v35 = vadd.f32 %v338_v6, %v310_v48  ;;  %v410_v44 = vpop.permute.xlu1 %409  ;;  %v408_v32 = vpop.permute.xlu0 %407  ;;  %v340_v37 = vrot.slane %v312_v54, 7  ;;  %v361_v7 = vrot.slane %v312_v54, 1 }
  0xed   : > { %v320_v49 = vrot.slane %v311_v45, 1  ;;  %v339_v50 = vrot.slane %v311_v45, 7 }
  0xee   : > { %v2178_v47 = vadd.f32 %v383_v33, %v360_v62  ;;  %v2180_v4 = vadd.f32 %v384_v35, %v377_v41  ;;  %965 = vrot.lane.b32.xlu1 %v2096_v46, %s1640_s20  ;;  %v378_v61 = vsel %vm354_vm2, %v361_v7, %v340_v37 }
  0xef   : > { %963 = vrot.lane.b32.xlu0 %v2110_v53, %s1640_s20  ;;  %v341_v51 = vsel %vm329_vm3, %v339_v50, %v340_v37  ;;  %v353_v52 = vsel %vm329_vm3, %v320_v49, %v339_v50  ;;  %v362_v0 = vsel %vm354_vm2, %v320_v49, %v361_v7 }
  0xf0   : > { %2766 = vst [vmem:[#allocation21_spill] sm:$0xff] %v2178_v47  ;;  %2767 = vst [vmem:[#allocation22_spill] sm:$0xff] %v2180_v4  ;;  %v2186_v48 = vpop.permute.xlu1 %413  ;;  %v2188_v5 = vpop.permute.xlu0 %411  ;;  %v385_v59 = vadd.f32 %v353_v52, %v311_v45  ;;  %v386_v56 = vadd.f32 %v341_v51, %v312_v54 }
  0xf2   : > { %969 = vrot.lane.b32.xlu1 %v2114_v58, %s1640_s20  ;;  %v2198_v40 = vadd.f32 %v385_v59, %v362_v0  ;;  %v2200_v60 = vadd.f32 %v386_v56, %v378_v61 }
  0xf3   : > { %967 = vrot.lane.b32.xlu0 %v2128_v34, %s1640_s20 }
  0xf4   : > { %2768 = vst [vmem:[#allocation23_spill] sm:$0xff] %v2198_v40  ;;  %2769 = vst [vmem:[#allocation24_spill] sm:$0xff] %v2200_v60  ;;  %v2202_v6 = vpop.permute.xlu1 %417  ;;  %v2204_v36 = vpop.permute.xlu0 %415 }
  0xf5   : > { %2770 = vst [vmem:[#allocation25_spill] sm:$0xff] %v2202_v6  ;;  %2771 = vst [vmem:[#allocation26_spill] sm:$0xff] %v2204_v36 }
  0xf8   : > { %v430_v62 = vpop.permute.xlu1 %429  ;;  %v428_v33 = vpop.permute.xlu0 %427 }
  0xf9   : > { %v452_v54 = vsel %vm279_vm0, %v406_v57, %v430_v62  ;;  %v460_v35 = vsel %vm288_vm1, %v406_v57, %v430_v62  ;;  %v451_v41 = vsel %vm279_vm0, %v404_v3, %v428_v33  ;;  %v459_v37 = vsel %vm288_vm1, %v404_v3, %v428_v33 }
  0xfa   : > { %v468_v7 = vadd.f32 %v452_v54, %v1887_v8  ;;  %v467_v45 = vadd.f32 %v451_v41, %v1890_v9 }
  0xfc   : > { %v476_v49 = vadd.f32 %v468_v7, %v460_v35  ;;  %v475_v50 = vadd.f32 %v467_v45, %v459_v37  ;;  %v434_v51 = vpop.permute.xlu1 %433  ;;  %v432_v52 = vpop.permute.xlu0 %431 }
  0xfd   : > { %v454_v0 = vsel %vm279_vm0, %v410_v44, %v434_v51  ;;  %v462_v59 = vsel %vm288_vm1, %v410_v44, %v434_v51  ;;  %v453_v56 = vsel %vm279_vm0, %v408_v32, %v432_v52  ;;  %v461_v57 = vsel %vm288_vm1, %v408_v32, %v432_v52 }
  0xfe   : > { %v500_v61 = vrot.slane %v476_v49, 7  ;;  %v523_v62 = vrot.slane %v476_v49, 1  ;;  %v487_v34 = vrot.slane %v475_v50, 1  ;;  %v499_v3 = vrot.slane %v475_v50, 7 }
  0xff   : > { %v470_v8 = vadd.f32 %v454_v0, %v1897_v10  ;;  %v469_v9 = vadd.f32 %v453_v56, %v1900_v11  ;;  %v2224_v11 = vmul.f32 %v2140_v63, %v2140_v63  ;;  %v2228_v0 = vmul.f32 %v2142_v1, %v2142_v1 }
 0x100   : > { %v501_v33 = vsel %vm329_vm3, %v499_v3, %v500_v61  ;;  %v519_v54 = vsel %vm329_vm3, %v487_v34, %v499_v3  ;;  %v524_v35 = vsel %vm354_vm2, %v487_v34, %v523_v62  ;;  %v582_v41 = vpop.permute.xlu1 %581  ;;  %v580_v44 = vpop.permute.xlu0 %579  ;;  %v543_v51 = vsel %vm354_vm2, %v523_v62, %v500_v61 }
 0x101   : > { %v547_v37 = vadd.f32 %v519_v54, %v475_v50  ;;  %v548_v7 = vadd.f32 %v501_v33, %v476_v49  ;;  %v478_v45 = vadd.f32 %v470_v8, %v462_v59  ;;  %v477_v32 = vadd.f32 %v469_v9, %v461_v57 }
 0x103   : > { %v555_v52 = vadd.f32 %v547_v37, %v524_v35  ;;  %v556_v58 = vadd.f32 %v548_v7, %v543_v51  ;;  %v503_v53 = vrot.slane %v478_v45, 7  ;;  %v525_v10 = vrot.slane %v478_v45, 1 }
 0x104   : > { %v488_v34 = vrot.slane %v477_v32, 1  ;;  %v502_v56 = vrot.slane %v477_v32, 7  ;;  %v586_v50 = vpop.permute.xlu1 %585  ;;  %v584_v49 = vpop.permute.xlu0 %583 }
 0x105   : > { %v2231_v59 = vmul.f32 %v555_v52, %v2140_v63  ;;  %v2234_v57 = vmul.f32 %v556_v58, %v2142_v1  ;;  %v2236_v61 = vmul.f32 %v555_v52, %v555_v52  ;;  %v2238_v62 = vmul.f32 %v556_v58, %v556_v58 }
 0x106   : > { %v504_v3 = vsel %vm329_vm3, %v502_v56, %v503_v53  ;;  %v520_v8 = vsel %vm329_vm3, %v488_v34, %v502_v56  ;;  %v526_v9 = vsel %vm354_vm2, %v488_v34, %v525_v10  ;;  %v544_v58 = vsel %vm354_vm2, %v525_v10, %v503_v53 }
 0x107   : > { %2772 = vst [vmem:[#allocation27_spill] sm:$0xff] %v2231_v59  ;;  %v2245_v33 = vadd.f32 %v2236_v61, %v2224_v11  ;;  %v2249_v63 = vadd.f32 %v2238_v62, %v2228_v0  ;;  %v549_v1 = vadd.f32 %v520_v8, %v477_v32  ;;  %v550_v54 = vadd.f32 %v504_v3, %v478_v45 }
 0x108   : > { %v590_v35 = vpop.permute.xlu1 %589  ;;  %v588_v37 = vpop.permute.xlu0 %587  ;;  %v2254_v52 = vmul.f32 %v2163_v55, %v2163_v55  ;;  %v2258_v34 = vmul.f32 %v2165_v2, %v2165_v2 }
 0x109   : > { %v557_v7 = vadd.f32 %v549_v1, %v526_v9  ;;  %v558_v51 = vadd.f32 %v550_v54, %v544_v58 }
 0x10b   : > { %v2261_v56 = vmul.f32 %v557_v7, %v2163_v55  ;;  %v2264_v32 = vmul.f32 %v558_v51, %v2165_v2  ;;  %v2266_v45 = vmul.f32 %v557_v7, %v557_v7  ;;  %v2268_v3 = vmul.f32 %v558_v51, %v558_v51 }
 0x10c   : > { %v594_v53 = vpop.permute.xlu1 %593  ;;  %v2270_v10 = vpop.permute.xlu0 %591 }
 0x10d   : > { %2773 = vst [vmem:[#allocation28_spill] sm:$0xff] %v2261_v56  ;;  %2774 = vst [vmem:[#allocation29_spill] sm:$0xff] %v2264_v32  ;;  %v2274_v8 = vadd.f32 %v2266_v45, %v2254_v52  ;;  %v2278_v9 = vadd.f32 %v2268_v3, %v2258_v34 }
 0x110   : > { %v606_v55 = vpop.permute.xlu1 %605  ;;  %v604_v1 = vpop.permute.xlu0 %603 }
 0x111   : > { %v628_v2 = vsel %vm279_vm0, %v582_v41, %v606_v55  ;;  %v627_v54 = vsel %vm279_vm0, %v580_v44, %v604_v1  ;;  %v636_v51 = vsel %vm288_vm1, %v582_v41, %v606_v55  ;;  %v635_v46 = vsel %vm288_vm1, %v580_v44, %v604_v1 }
 0x112   : > { %v644_v58 = vadd.f32 %v628_v2, %v1936_v16  ;;  %v643_v7 = vadd.f32 %v627_v54, %v1940_v17 }
 0x114   : > { %v652_v43 = vadd.f32 %v644_v58, %v636_v51  ;;  %v651_v42 = vadd.f32 %v643_v7, %v635_v46  ;;  %v610_v39 = vpop.permute.xlu1 %609  ;;  %v608_v38 = vpop.permute.xlu0 %607 }
 0x115   : > { %v630_v32 = vsel %vm279_vm0, %v586_v50, %v610_v39  ;;  %v629_v56 = vsel %vm279_vm0, %v584_v49, %v608_v38  ;;  %v638_v16 = vsel %vm288_vm1, %v586_v50, %v610_v39  ;;  %v637_v41 = vsel %vm288_vm1, %v584_v49, %v608_v38 }
 0x116   : > { %v676_v15 = vrot.slane %v652_v43, 7  ;;  %v699_v60 = vrot.slane %v652_v43, 1  ;;  %v663_v36 = vrot.slane %v651_v42, 1  ;;  %v675_v14 = vrot.slane %v651_v42, 7 }
 0x117   : > { %v646_v17 = vadd.f32 %v630_v32, %v1948_v18  ;;  %v645_v44 = vadd.f32 %v629_v56, %v1952_v19 }
 0x118   : > { %v719_v46 = vsel %vm354_vm2, %v699_v60, %v676_v15  ;;  %v677_v55 = vsel %vm329_vm3, %v675_v14, %v676_v15  ;;  %v695_v1 = vsel %vm329_vm3, %v663_v36, %v675_v14  ;;  %v700_v2 = vsel %vm354_vm2, %v663_v36, %v699_v60  ;;  %v614_v54 = vpop.permute.xlu1 %613  ;;  %v612_v58 = vpop.permute.xlu0 %611 }
 0x119   : > { %v723_v7 = vadd.f32 %v695_v1, %v651_v42  ;;  %v724_v51 = vadd.f32 %v677_v55, %v652_v43  ;;  %v654_v6 = vadd.f32 %v646_v17, %v638_v16  ;;  %v653_v39 = vadd.f32 %v645_v44, %v637_v41 }
 0x11a   : > { %v632_v18 = vsel %vm279_vm0, %v590_v35, %v614_v54  ;;  %v640_v38 = vsel %vm288_vm1, %v590_v35, %v614_v54  ;;  %v631_v19 = vsel %vm279_vm0, %v588_v37, %v612_v58  ;;  %v639_v50 = vsel %vm288_vm1, %v588_v37, %v612_v58 }
 0x11b   : > { %v2300_v49 = vadd.f32 %v723_v7, %v700_v2  ;;  %v2302_v15 = vadd.f32 %v724_v51, %v719_v46  ;;  %v679_v14 = vrot.slane %v654_v6, 7  ;;  %v701_v60 = vrot.slane %v654_v6, 1 }
 0x11c   : > { %v664_v36 = vrot.slane %v653_v39, 1  ;;  %v678_v56 = vrot.slane %v653_v39, 7  ;;  %v648_v42 = vadd.f32 %v632_v18, %v1960_v20  ;;  %v647_v43 = vadd.f32 %v631_v19, %v1964_v21  ;;  %v618_v32 = vpop.permute.xlu1 %617  ;;  %v616_v16 = vpop.permute.xlu0 %615 }
 0x11d   : > { %v720_v35 = vsel %vm354_vm2, %v701_v60, %v679_v14  ;;  %v634_v17 = vsel %vm279_vm0, %v594_v53, %v618_v32  ;;  %v642_v37 = vsel %vm288_vm1, %v594_v53, %v618_v32  ;;  %v633_v41 = vsel %vm279_vm0, %v2270_v10, %v616_v16 }
 0x11e   : > { %v680_v44 = vsel %vm329_vm3, %v678_v56, %v679_v14  ;;  %v696_v46 = vsel %vm329_vm3, %v664_v36, %v678_v56  ;;  %v702_v55 = vsel %vm354_vm2, %v664_v36, %v701_v60  ;;  %v656_v20 = vadd.f32 %v648_v42, %v640_v38 }
 0x11f   : > { %v725_v1 = vadd.f32 %v696_v46, %v653_v39  ;;  %v726_v21 = vadd.f32 %v680_v44, %v654_v6  ;;  %v655_v2 = vadd.f32 %v647_v43, %v639_v50  ;;  %v650_v54 = vadd.f32 %v634_v17, %v1972_v22 }
 0x120   : > { %v682_v58 = vrot.slane %v656_v20, 7  ;;  %v703_v7 = vrot.slane %v656_v20, 1  ;;  %v641_v53 = vsel %vm288_vm1, %v2270_v10, %v616_v16  ;;  %v649_v51 = vadd.f32 %v633_v41, %v1976_v23  ;;  %v758_v18 = vpop.permute.xlu1 %757  ;;  %v756_v19 = vpop.permute.xlu0 %755 }
 0x121   : > { %v2318_v14 = vadd.f32 %v725_v1, %v702_v55  ;;  %v2320_v56 = vadd.f32 %v726_v21, %v720_v35  ;;  %v665_v60 = vrot.slane %v655_v2, 1  ;;  %v681_v38 = vrot.slane %v655_v2, 7 }
 0x122   : > { %v658_v39 = vadd.f32 %v650_v54, %v642_v37  ;;  %v657_v6 = vadd.f32 %v649_v51, %v641_v53  ;;  %v721_v17 = vsel %vm354_vm2, %v703_v7, %v682_v58 }
 0x123   : > { %v683_v50 = vsel %vm329_vm3, %v681_v38, %v682_v58  ;;  %v697_v22 = vsel %vm329_vm3, %v665_v60, %v681_v38  ;;  %v704_v36 = vsel %vm354_vm2, %v665_v60, %v703_v7 }
 0x124   : > { %v727_v42 = vadd.f32 %v697_v22, %v655_v2  ;;  %v728_v10 = vadd.f32 %v683_v50, %v656_v20  ;;  %v685_v43 = vrot.slane %v658_v39, 7  ;;  %v705_v23 = vrot.slane %v658_v39, 1  ;;  %v762_v32 = vpop.permute.xlu1 %761  ;;  %v760_v16 = vpop.permute.xlu0 %759 }
 0x125   : > { %v666_v35 = vrot.slane %v657_v6, 1  ;;  %v684_v41 = vrot.slane %v657_v6, 7 }
 0x126   : > { %v2326_v44 = vadd.f32 %v727_v42, %v704_v36  ;;  %v2328_v37 = vadd.f32 %v728_v10, %v721_v17  ;;  %v722_v53 = vsel %vm354_vm2, %v705_v23, %v685_v43 }
 0x127   : > { %v686_v46 = vsel %vm329_vm3, %v684_v41, %v685_v43  ;;  %v698_v55 = vsel %vm329_vm3, %v666_v35, %v684_v41  ;;  %v706_v1 = vsel %vm354_vm2, %v666_v35, %v705_v23  ;;  %v2350_v43 = vmul.f32 %v2178_v47, %v2178_v47 }
 0x128   : > { %v729_v21 = vadd.f32 %v698_v55, %v657_v6  ;;  %v730_v20 = vadd.f32 %v686_v46, %v658_v39  ;;  %v766_v2 = vpop.permute.xlu1 %765  ;;  %v764_v54 = vpop.permute.xlu0 %763  ;;  %v2354_v23 = vmul.f32 %v2180_v4, %v2180_v4 }
 0x12a   : > { %v2334_v51 = vadd.f32 %v729_v21, %v706_v1  ;;  %v2336_v58 = vadd.f32 %v730_v20, %v722_v53  ;;  %v2366_v53 = vadd.f32 0.0081, %v2245_v33 }
 0x12c   : > { %v2338_v7 = vpop.permute.xlu1 %769  ;;  %v2340_v60 = vpop.permute.xlu0 %767 }
 0x130   : > { %v782_v38 = vpop.permute.xlu1 %781  ;;  %v780_v50 = vpop.permute.xlu0 %779 }
 0x131   : > { %v804_v22 = vsel %vm279_vm0, %v758_v18, %v782_v38  ;;  %v803_v36 = vsel %vm279_vm0, %v756_v19, %v780_v50  ;;  %v812_v42 = vsel %vm288_vm1, %v758_v18, %v782_v38  ;;  %v811_v10 = vsel %vm288_vm1, %v756_v19, %v780_v50 }
 0x132   : > { %v820_v39 = vadd.f32 %v804_v22, %v2000_v24  ;;  %v819_v6 = vadd.f32 %v803_v36, %v2004_v25  ;;  %v2358_v24 = vmul.f32 %v2198_v40, %v2198_v40  ;;  %v2361_v25 = vmul.f32 2.0, %v2231_v59 }
 0x134   : > { %v828_v17 = vadd.f32 %v820_v39, %v812_v42  ;;  %v827_v35 = vadd.f32 %v819_v6, %v811_v10  ;;  %v786_v41 = vpop.permute.xlu1 %785  ;;  %v784_v46 = vpop.permute.xlu0 %783  ;;  %2775 = vst [vmem:[#allocation30_spill] sm:$0xff] %v2358_v24 }
 0x135   : > { %v806_v18 = vsel %vm279_vm0, %v762_v32, %v786_v41  ;;  %v805_v19 = vsel %vm279_vm0, %v760_v16, %v784_v46  ;;  %v814_v38 = vsel %vm288_vm1, %v762_v32, %v786_v41  ;;  %v813_v42 = vsel %vm288_vm1, %v760_v16, %v784_v46 }
 0x136   : > { %v852_v55 = vrot.slane %v828_v17, 7  ;;  %v875_v1 = vrot.slane %v828_v17, 1  ;;  %v839_v21 = vrot.slane %v827_v35, 1  ;;  %v851_v20 = vrot.slane %v827_v35, 7 }
 0x137   : > { %v822_v50 = vadd.f32 %v806_v18, %v2012_v26  ;;  %v821_v22 = vadd.f32 %v805_v19, %v2016_v27 }
 0x138   : > { %v895_v36 = vsel %vm354_vm2, %v875_v1, %v852_v55  ;;  %v853_v39 = vsel %vm329_vm3, %v851_v20, %v852_v55  ;;  %v871_v6 = vsel %vm329_vm3, %v839_v21, %v851_v20  ;;  %v790_v10 = vpop.permute.xlu1 %789  ;;  %v788_v59 = vpop.permute.xlu0 %787  ;;  %v876_v32 = vsel %vm354_vm2, %v839_v21, %v875_v1 }
 0x139   : > { %v899_v40 = vadd.f32 %v871_v6, %v827_v35  ;;  %v900_v4 = vadd.f32 %v853_v39, %v828_v17  ;;  %v830_v33 = vadd.f32 %v822_v50, %v814_v38  ;;  %v829_v47 = vadd.f32 %v821_v22, %v813_v42 }
 0x13a   : > { %v808_v26 = vsel %vm279_vm0, %v766_v2, %v790_v10  ;;  %v816_v27 = vsel %vm288_vm1, %v766_v2, %v790_v10  ;;  %v807_v41 = vsel %vm279_vm0, %v764_v54, %v788_v59 }
 0x13b   : > { %v907_v18 = vadd.f32 %v899_v40, %v876_v32  ;;  %v908_v19 = vadd.f32 %v900_v4, %v895_v36  ;;  %v855_v55 = vrot.slane %v830_v33, 7  ;;  %v877_v20 = vrot.slane %v830_v33, 1 }
 0x13c   : > { %v840_v24 = vrot.slane %v829_v47, 1  ;;  %v854_v16 = vrot.slane %v829_v47, 7  ;;  %v824_v46 = vadd.f32 %v808_v26, %v2024_v28  ;;  %v823_v17 = vadd.f32 %v807_v41, %v2028_v29  ;;  %v794_v35 = vpop.permute.xlu1 %793  ;;  %v2381_v38 = vpop.permute.xlu0 %791 }
 0x13d   : > { %v1187_v1 = vadd.f32 %v907_v18, %v2300_v49  ;;  %v1188_v21 = vadd.f32 %v908_v19, %v2302_v15  ;;  %v896_v2 = vsel %vm354_vm2, %v877_v20, %v855_v55  ;;  %v815_v40 = vsel %vm288_vm1, %v764_v54, %v788_v59 }
 0x13e   : > { %v856_v4 = vsel %vm329_vm3, %v854_v16, %v855_v55  ;;  %v872_v50 = vsel %vm329_vm3, %v840_v24, %v854_v16  ;;  %v832_v22 = vadd.f32 %v824_v46, %v816_v27  ;;  %v810_v28 = vsel %vm279_vm0, %v2338_v7, %v794_v35 }
 0x13f   : > { %v1195_v29 = vmul.f32 9.0, %v1187_v1  ;;  %v1196_v36 = vmul.f32 9.0, %v1188_v21  ;;  %v901_v39 = vadd.f32 %v872_v50, %v829_v47  ;;  %v902_v6 = vadd.f32 %v856_v4, %v830_v33 }
 0x140   : > { %v878_v49 = vsel %vm354_vm2, %v840_v24, %v877_v20  ;;  %v858_v42 = vrot.slane %v832_v22, 7  ;;  %v879_v15 = vrot.slane %v832_v22, 1  ;;  %v831_v10 = vadd.f32 %v823_v17, %v815_v40  ;;  %v438_v32 = vpop.permute.xlu1 %437  ;;  %v2392_v26 = vpop.permute.xlu0 %435 }
 0x141   : > { %v1203_v59 = vsub.f32 %v1195_v29, %v2224_v11  ;;  %v1204_v54 = vsub.f32 %v1196_v36, %v2228_v0  ;;  %v909_v27 = vadd.f32 %v901_v39, %v878_v49  ;;  %v910_v41 = vadd.f32 %v902_v6, %v896_v2 }
 0x142   : > { %v841_v18 = vrot.slane %v831_v10, 1  ;;  %v857_v19 = vrot.slane %v831_v10, 7  ;;  %v818_v47 = vsel %vm288_vm1, %v2338_v7, %v794_v35  ;;  %v826_v33 = vadd.f32 %v810_v28, %v2036_v30 }
 0x143   : > { %v1211_v24 = vsub.f32 %v1203_v59, %v2236_v61  ;;  %v1212_v55 = vsub.f32 %v1204_v54, %v2238_v62  ;;  %v1189_v20 = vadd.f32 %v909_v27, %v2318_v14  ;;  %v1190_v16 = vadd.f32 %v910_v41, %v2320_v56 }
 0x144   : > { %v1180_v11 = vadd.f32 0.0081, %v2249_v63  ;;  %v859_v0 = vsel %vm329_vm3, %v857_v19, %v858_v42  ;;  %v873_v46 = vsel %vm329_vm3, %v841_v18, %v857_v19  ;;  %v834_v17 = vadd.f32 %v826_v33, %v818_v47  ;;  %v2406_v1 = vpop.permute.xlu1 %441  ;;  %v2408_v7 = vpop.permute.xlu0 %439 }
 0x145   : > { %v1219_v30 = vadd.f32 0.0729, %v1211_v24  ;;  %v1220_v35 = vadd.f32 0.0729, %v1212_v55  ;;  %v1197_v61 = vmul.f32 9.0, %v1189_v20  ;;  %v1198_v21 = vmul.f32 9.0, %v1190_v16 }
 0x146   : > { %v897_v62 = vsel %vm354_vm2, %v879_v15, %v858_v42  ;;  %v880_v14 = vsel %vm354_vm2, %v841_v18, %v879_v15  ;;  %v903_v56 = vadd.f32 %v873_v46, %v831_v10  ;;  %v904_v2 = vadd.f32 %v859_v0, %v832_v22 }
 0x147   : > { %v2413_v63 = vmul.f32 %v1219_v30, %v2366_v53  ;;  %v2415_v40 = vmul.f32 %v1220_v35, %v1180_v11  ;;  %v1205_v4 = vsub.f32 %v1197_v61, %v2254_v52  ;;  %v1206_v50 = vsub.f32 %v1198_v21, %v2258_v34  ;;  %v2776_v11 = vld [vmem:[#allocation25_spill] sm:$0xff] }
 0x148   : > { %v1181_v28 = vadd.f32 0.0081, %v2274_v8  ;;  %v911_v29 = vadd.f32 %v903_v56, %v880_v14  ;;  %v912_v36 = vadd.f32 %v904_v2, %v897_v62  ;;  %v809_v39 = vsel %vm279_vm0, %v2340_v60, %v2381_v38  ;;  %v2423_v6 = vpop.permute.xlu1 %933  ;;  %v2425_v22 = vpop.permute.xlu0 %931 }
 0x149   : > { %v1182_v53 = vadd.f32 0.0081, %v2278_v9  ;;  %v1213_v49 = vsub.f32 %v1205_v4, %v2266_v45  ;;  %v1214_v52 = vsub.f32 %v1206_v50, %v2268_v3  ;;  %v861_v42 = vrot.slane %v834_v17, 7  ;;  %v2777_v4 = vld [vmem:[#allocation11_spill] sm:$0xff] }
 0x14a   : > { %v1191_v34 = vadd.f32 %v911_v29, %v2326_v44  ;;  %v1192_v8 = vadd.f32 %v912_v36, %v2328_v37  ;;  %v881_v15 = vrot.slane %v834_v17, 1  ;;  %v825_v10 = vadd.f32 %v809_v39, %v2040_v31  ;;  %v2779_v36 = vld [vmem:[#allocation24_spill] sm:$0xff] }
 0x14b   : > { %v1221_v59 = vadd.f32 0.0729, %v1213_v49  ;;  %v1222_v54 = vadd.f32 0.0729, %v1214_v52  ;;  %v817_v27 = vsel %vm288_vm1, %v2340_v60, %v2381_v38  ;;  %v456_v9 = vsel %vm279_vm0, %v2186_v48, %v438_v32 }
 0x14c   : > { %v2438_v45 = vmul.f32 9.0, %v1191_v34  ;;  %v2440_v3 = vmul.f32 9.0, %v1192_v8  ;;  %v833_v41 = vadd.f32 %v825_v10, %v817_v27  ;;  %v472_v44 = vadd.f32 %v456_v9, %v1907_v12  ;;  %v2443_v37 = vpop.permute.xlu1 %937  ;;  %v2445_v18 = vpop.permute.xlu0 %935 }
 0x14d   : > { %v2447_v31 = vmul.f32 %v1221_v59, %v1181_v28  ;;  %v2449_v19 = vmul.f32 %v1222_v54, %v1182_v53  ;;  %v464_v60 = vsel %vm288_vm1, %v2186_v48, %v438_v32  ;;  %v455_v38 = vsel %vm279_vm0, %v2188_v5, %v2392_v26  ;;  %v2778_v28 = vld [vmem:[#allocation26_spill] sm:$0xff] }
 0x14e   : > { %v1207_v47 = vsub.f32 %v2438_v45, %v2350_v43  ;;  %v1208_v12 = vsub.f32 %v2440_v3, %v2354_v23  ;;  %v842_v33 = vrot.slane %v833_v41, 1  ;;  %v860_v24 = vrot.slane %v833_v41, 7 }
 0x14f   : > { %v1116_v55 = vmul.f32 2.0, %v2234_v57  ;;  %v480_v20 = vadd.f32 %v472_v44, %v464_v60  ;;  %v471_v16 = vadd.f32 %v455_v38, %v1910_v13  ;;  %v458_v48 = vsel %vm279_vm0, %v2776_v11, %v2406_v1 }
 0x150   : > { %v898_v32 = vsel %vm354_vm2, %v881_v15, %v861_v42  ;;  %v862_v0 = vsel %vm329_vm3, %v860_v24, %v861_v42  ;;  %v874_v46 = vsel %vm329_vm3, %v842_v33, %v860_v24  ;;  %v463_v30 = vsel %vm288_vm1, %v2188_v5, %v2392_v26  ;;  %v2471_v35 = vpop.permute.xlu1 %941  ;;  %v2474_v14 = vpop.permute.xlu0 %939  ;;  %v2780_v42 = vld [vmem:[#allocation12_spill] sm:$0xff] }
 0x151   : > { %v882_v61 = vsel %vm354_vm2, %v842_v33, %v881_v15  ;;  %v905_v21 = vadd.f32 %v874_v46, %v833_v41  ;;  %v906_v13 = vadd.f32 %v862_v0, %v834_v17  ;;  %v506_v62 = vrot.slane %v480_v20, 7  ;;  %v2782_v46 = vld [vmem:[#allocation28_spill] sm:$0xff] }
 0x152   : > { %v527_v56 = vrot.slane %v480_v20, 1  ;;  %v479_v2 = vadd.f32 %v471_v16, %v463_v30  ;;  %v474_v50 = vadd.f32 %v458_v48, %v2777_v4  ;;  %v457_v29 = vsel %vm279_vm0, %v2778_v28, %v2408_v7  ;;  %v2781_v16 = vld [vmem:[#allocation30_spill] sm:$0xff] }
 0x153   : > { %v2482_v5 = vmul.f32 %v2779_v36, %v2779_v36  ;;  %v913_v26 = vadd.f32 %v905_v21, %v882_v61  ;;  %v914_v39 = vadd.f32 %v906_v13, %v898_v32  ;;  %v466_v17 = vsel %vm288_vm1, %v2776_v11, %v2406_v1  ;;  %v2783_v61 = vld [vmem:[#allocation29_spill] sm:$0xff] }
 0x154   : > { %v489_v53 = vrot.slane %v479_v2, 1  ;;  %v505_v49 = vrot.slane %v479_v2, 7  ;;  %v482_v52 = vadd.f32 %v474_v50, %v466_v17  ;;  %v473_v34 = vadd.f32 %v457_v29, %v2780_v42  ;;  %v2488_v8 = vpop.permute.xlu1 %945 }
 0x155   : > { %v2491_v15 = vadd.f32 0.0081, %v2361_v25  ;;  %v2493_v10 = vadd.f32 0.0081, %v1116_v55  ;;  %v1193_v59 = vadd.f32 %v913_v26, %v2334_v51  ;;  %v1194_v54 = vadd.f32 %v914_v39, %v2336_v58  ;;  %v2505_v33 = vpop.permute.xlu0 %943  ;;  %v2785_v26 = vld [vmem:[#allocation22_spill] sm:$0xff] }
 0x156   : > { %v545_v27 = vsel %vm354_vm2, %v527_v56, %v506_v62  ;;  %v507_v1 = vsel %vm329_vm3, %v505_v49, %v506_v62  ;;  %v521_v9 = vsel %vm329_vm3, %v489_v53, %v505_v49  ;;  %v465_v41 = vsel %vm288_vm1, %v2778_v28, %v2408_v7  ;;  %v2784_v62 = vld [vmem:[#allocation21_spill] sm:$0xff] }
 0x157   : > { %v1201_v44 = vmul.f32 9.0, %v1193_v59  ;;  %v2503_v60 = vmul.f32 9.0, %v1194_v54  ;;  %v551_v25 = vadd.f32 %v521_v9, %v479_v2  ;;  %v552_v38 = vadd.f32 %v507_v1, %v480_v20  ;;  %v2786_v9 = vld [vmem:[#allocation13_spill] sm:$0xff] }
 0x158   : > { %v528_v51 = vsel %vm354_vm2, %v489_v53, %v527_v56  ;;  %v509_v58 = vrot.slane %v482_v52, 7  ;;  %v529_v24 = vrot.slane %v482_v52, 1  ;;  %v481_v55 = vadd.f32 %v473_v34, %v465_v41  ;;  %v958_v7 = vpop.permute.xlu1 %957 }
 0x159   : > { %v1209_v11 = vsub.f32 %v1201_v44, %v2781_v16  ;;  %v1210_v48 = vsub.f32 %v2503_v60, %v2482_v5  ;;  %v559_v32 = vadd.f32 %v551_v25, %v528_v51  ;;  %v560_v0 = vadd.f32 %v552_v38, %v545_v27  ;;  %v956_v49 = vpop.permute.xlu0 %955 }
 0x15a   : > { %v1117_v30 = vmul.f32 2.0, %v2782_v46  ;;  %v1118_v21 = vmul.f32 2.0, %v2783_v61  ;;  %v490_v20 = vrot.slane %v481_v55, 1  ;;  %v508_v13 = vrot.slane %v481_v55, 7 }
 0x15b   : > { %1487 = vrcp.f32 %v2413_v63  ;;  %v2515_v56 = vmul.f32 %v559_v32, %v2784_v62  ;;  %v1111_v2 = vmul.f32 %v559_v32, %v559_v32  ;;  %v1112_v4 = vmul.f32 %v560_v0, %v560_v0 }
 0x15c   : > { %1489 = vrcp.f32 %v2415_v40  ;;  %v510_v50 = vsel %vm329_vm3, %v508_v13, %v509_v58  ;;  %v522_v28 = vsel %vm329_vm3, %v490_v20, %v508_v13  ;;  %v980_v29 = vsel %vm279_vm0, %v2423_v6, %v958_v7  ;;  %v962_v3 = vpop.permute.xlu1 %961 }
 0x15d   : > { %v2523_v39 = vmul.f32 %v560_v0, %v2785_v26  ;;  %v1175_v17 = vadd.f32 %v1111_v2, %v2350_v43  ;;  %v1176_v63 = vadd.f32 %v1112_v4, %v2354_v23  ;;  %v546_v53 = vsel %vm354_vm2, %v529_v24, %v509_v58 }
 0x15e   : > { %v1215_v40 = vsub.f32 %v1207_v47, %v1111_v2  ;;  %v1216_v42 = vsub.f32 %v1208_v12, %v1112_v4  ;;  %v553_v34 = vadd.f32 %v522_v28, %v481_v55  ;;  %v554_v59 = vadd.f32 %v510_v50, %v482_v52 }
 0x15f   : > { %v1119_v54 = vmul.f32 2.0, %v2515_v56  ;;  %v1183_v27 = vadd.f32 0.0081, %v1175_v17  ;;  %v530_v1 = vsel %vm354_vm2, %v490_v20, %v529_v24  ;;  %v996_v41 = vadd.f32 %v980_v29, %v2786_v9  ;;  %v2788_v17 = vld [vmem:[#allocation14_spill] sm:$0xff] }
 0x160   : > { %v1184_v44 = vadd.f32 0.0081, %v1176_v63  ;;  %v1223_v60 = vadd.f32 0.0729, %v1215_v40  ;;  %v1224_v25 = vadd.f32 0.0729, %v1216_v42  ;;  %v561_v38 = vadd.f32 %v553_v34, %v530_v1 }
 0x161   : > { %1491 = vrcp.f32 %v2447_v31  ;;  %v1120_v43 = vmul.f32 2.0, %v2523_v39  ;;  %v562_v45 = vadd.f32 %v554_v59, %v546_v53  ;;  %v988_v23 = vsel %vm288_vm1, %v2423_v6, %v958_v7  ;;  %v960_v31 = vpop.permute.xlu0 %959  ;;  %v966_v53 = vpop.permute.xlu1 %965  ;;  %v2789_v34 = vld [vmem:[#allocation15_spill] sm:$0xff]  ;;  %v2790_v1 = vld [vmem:[#allocation16_spill] sm:$0xff] }
 0x162   : > { %v1231_v47 = vmul.f32 %v1223_v60, %v1183_v27  ;;  %v2541_v12 = vmul.f32 %v1224_v25, %v1184_v44  ;;  %v1113_v52 = vmul.f32 %v561_v38, %v561_v38  ;;  %v1004_v51 = vadd.f32 %v996_v41, %v988_v23 }
 0x163   : > { %v2543_v58 = vadd.f32 0.0081, %v1117_v30  ;;  %v2545_v24 = vadd.f32 0.0081, %v1118_v21  ;;  %1493 = vrcp.f32 %v2449_v19  ;;  %v1114_v55 = vmul.f32 %v562_v45, %v562_v45 }
 0x164   : > { %v2548_v32 = vadd.f32 0.0081, %v1119_v54  ;;  %v1177_v0 = vadd.f32 %v1113_v52, %v2781_v16  ;;  %v1217_v20 = vsub.f32 %v1209_v11, %v1113_v52  ;;  %v979_v6 = vsel %vm279_vm0, %v2425_v22, %v956_v49  ;;  %v2787_v11 = vld [vmem:[#allocation23_spill] sm:$0xff] }
 0x165   : > { %v2553_v7 = vpop.eup %1487  ;;  %v2555_v13 = vadd.f32 0.0081, %v1120_v43  ;;  %v1178_v30 = vadd.f32 %v1114_v55, %v2482_v5  ;;  %v1218_v21 = vsub.f32 %v1210_v48, %v1114_v55  ;;  %v987_v19 = vsel %vm288_vm1, %v2425_v22, %v956_v49  ;;  %v964_v54 = vpop.permute.xlu0 %963 }
 0x166   : > { %v2560_v62 = vpop.eup %1489  ;;  %v1185_v2 = vadd.f32 0.0081, %v1177_v0  ;;  %v1225_v4 = vadd.f32 0.0729, %v1217_v20  ;;  %v1028_v50 = vrot.slane %v1004_v51, 7  ;;  %v1051_v16 = vrot.slane %v1004_v51, 1 }
 0x167   : > { %v2563_v28 = vmul.f32 %v561_v38, %v2787_v11  ;;  %v1186_v29 = vadd.f32 0.0081, %v1178_v30  ;;  %v1226_v26 = vadd.f32 0.0729, %v1218_v21  ;;  %v995_v63 = vadd.f32 %v979_v6, %v2788_v17  ;;  %v2792_v11 = vld [vmem:[#allocation18_spill] sm:$0xff] }
 0x168   : > { %v2567_v5 = vmul.f32 %v562_v45, %v2779_v36  ;;  %v2569_v48 = vmul.f32 %v1225_v4, %v1185_v2  ;;  %v982_v22 = vsel %vm279_vm0, %v2443_v37, %v962_v3  ;;  %v981_v49 = vsel %vm279_vm0, %v2445_v18, %v960_v31 }
 0x169   : > { %1495 = vrcp.f32 %v1231_v47  ;;  %v2575_v40 = vmul.f32 %v1226_v26, %v1186_v29  ;;  %v1003_v42 = vadd.f32 %v995_v63, %v987_v19  ;;  %v998_v59 = vadd.f32 %v982_v22, %v2789_v34  ;;  %v2791_v47 = vld [vmem:[#allocation17_spill] sm:$0xff] }
 0x16a   : > { %v1071_v27 = vsel %vm354_vm2, %v1051_v16, %v1028_v50  ;;  %v990_v36 = vsel %vm288_vm1, %v2443_v37, %v962_v3  ;;  %v997_v9 = vadd.f32 %v981_v49, %v2790_v1  ;;  %v984_v41 = vsel %vm279_vm0, %v2471_v35, %v966_v53  ;;  %v2793_v1 = vld [vmem:[#allocation19_spill] sm:$0xff] }
 0x16b   : > { %v2584_v44 = vpop.eup %1491  ;;  %v1015_v60 = vrot.slane %v1003_v42, 1  ;;  %v1027_v25 = vrot.slane %v1003_v42, 7  ;;  %v1006_v38 = vadd.f32 %v998_v59, %v990_v36  ;;  %v989_v43 = vsel %vm288_vm1, %v2445_v18, %v960_v31  ;;  %v970_v18 = vpop.permute.xlu1 %969 }
 0x16c   : > { %v1005_v45 = vadd.f32 %v997_v9, %v989_v43  ;;  %v992_v23 = vsel %vm288_vm1, %v2471_v35, %v966_v53  ;;  %v1000_v52 = vadd.f32 %v984_v41, %v2791_v47  ;;  %v983_v37 = vsel %vm279_vm0, %v2474_v14, %v964_v54  ;;  %v2794_v41 = vld [vmem:[#allocation27_spill] sm:$0xff]  ;;  %v968_v47 = vpop.permute.xlu0 %967 }
 0x16d   : > { %v2593_v3 = vpop.eup %1493  ;;  %v1029_v55 = vsel %vm329_vm3, %v1027_v25, %v1028_v50  ;;  %v1047_v0 = vsel %vm329_vm3, %v1015_v60, %v1027_v25  ;;  %v1031_v20 = vrot.slane %v1006_v38, 7  ;;  %v991_v6 = vsel %vm288_vm1, %v2474_v14, %v964_v54 }
 0x16e   : > { %v1075_v31 = vadd.f32 %v1047_v0, %v1003_v42  ;;  %v1076_v30 = vadd.f32 %v1029_v55, %v1004_v51  ;;  %v1053_v21 = vrot.slane %v1006_v38, 1  ;;  %v1016_v35 = vrot.slane %v1005_v45, 1 }
 0x16f   : > { %v1052_v19 = vsel %vm354_vm2, %v1015_v60, %v1051_v16  ;;  %v1030_v2 = vrot.slane %v1005_v45, 7  ;;  %v1008_v4 = vadd.f32 %v1000_v52, %v992_v23  ;;  %v999_v29 = vadd.f32 %v983_v37, %v2792_v11 }
 0x170   : > { %v1083_v26 = vadd.f32 %v1075_v31, %v1052_v19  ;;  %v1084_v17 = vadd.f32 %v1076_v30, %v1071_v27  ;;  %v1072_v50 = vsel %vm354_vm2, %v1053_v21, %v1031_v20  ;;  %v986_v63 = vsel %vm279_vm0, %v2488_v8, %v970_v18 }
 0x171   : > { %v1032_v14 = vsel %vm329_vm3, %v1030_v2, %v1031_v20  ;;  %v1048_v53 = vsel %vm329_vm3, %v1016_v35, %v1030_v2  ;;  %v1054_v51 = vsel %vm354_vm2, %v1016_v35, %v1053_v21  ;;  %v1034_v22 = vrot.slane %v1008_v4, 7 }
 0x172   : > { %v1131_v49 = vmul.f32 9.0, %v1083_v26  ;;  %v1132_v16 = vmul.f32 9.0, %v1084_v17  ;;  %v1077_v42 = vadd.f32 %v1048_v53, %v1005_v45  ;;  %v1078_v34 = vadd.f32 %v1032_v14, %v1006_v38  ;;  %v2795_v53 = vld [vmem:[#allocation20_spill] sm:$0xff] }
 0x173   : > { %v2607_v59 = vpop.eup %1495  ;;  %v1055_v54 = vrot.slane %v1008_v4, 1  ;;  %v1007_v27 = vadd.f32 %v999_v29, %v991_v6  ;;  %v994_v36 = vsel %vm288_vm1, %v2488_v8, %v970_v18  ;;  %v1002_v9 = vadd.f32 %v986_v63, %v2793_v1 }
 0x174   : > { %v1139_v60 = vsub.f32 %v1131_v49, %v2794_v41  ;;  %v1140_v25 = vsub.f32 %v1132_v16, %v2234_v57  ;;  %v1085_v43 = vadd.f32 %v1077_v42, %v1054_v51  ;;  %v1086_v23 = vadd.f32 %v1078_v34, %v1072_v50 }
 0x175   : > { %1497 = vrcp.f32 %v2541_v12  ;;  %v1017_v45 = vrot.slane %v1007_v27, 1  ;;  %v1033_v38 = vrot.slane %v1007_v27, 7  ;;  %v2615_v52 = vadd.f32 %v1002_v9, %v994_v36 }
 0x176   : > { %v1147_v37 = vmul.f32 2.0, %v1139_v60  ;;  %v1148_v55 = vmul.f32 2.0, %v1140_v25  ;;  %v1133_v0 = vmul.f32 9.0, %v1085_v43  ;;  %v1134_v20 = vmul.f32 9.0, %v1086_v23 }
 0x177   : > { %v1073_v8 = vsel %vm354_vm2, %v1055_v54, %v1034_v22  ;;  %v1035_v6 = vsel %vm329_vm3, %v1033_v38, %v1034_v22  ;;  %v1049_v18 = vsel %vm329_vm3, %v1017_v45, %v1033_v38  ;;  %v985_v57 = vsel %vm279_vm0, %v2505_v33, %v968_v47 }
 0x178   : > { %v1155_v31 = vadd.f32 0.0729, %v1147_v37  ;;  %v1156_v30 = vadd.f32 0.0729, %v1148_v55  ;;  %v1141_v12 = vsub.f32 %v1133_v0, %v2782_v46  ;;  %v1142_v21 = vsub.f32 %v1134_v20, %v2783_v61 }
 0x179   : > { %v1056_v35 = vsel %vm354_vm2, %v1017_v45, %v1055_v54  ;;  %v1079_v19 = vadd.f32 %v1049_v18, %v1007_v27  ;;  %v1080_v2 = vadd.f32 %v1035_v6, %v1008_v4  ;;  %v1037_v11 = vrot.slane %v2615_v52, 7 }
 0x17a   : > { %v1163_v29 = vmul.f32 %v1155_v31, %v2491_v15  ;;  %v1164_v26 = vmul.f32 %v1156_v30, %v2493_v10  ;;  %v1149_v17 = vmul.f32 2.0, %v1141_v12  ;;  %v1150_v50 = vmul.f32 2.0, %v1142_v21 }
 0x17b   : > { %v1087_v63 = vadd.f32 %v1079_v19, %v1056_v35  ;;  %v1088_v14 = vadd.f32 %v1080_v2, %v1073_v8  ;;  %v993_v46 = vsel %vm288_vm1, %v2505_v33, %v968_v47  ;;  %v1001_v61 = vadd.f32 %v985_v57, %v2795_v53 }
 0x17c   : > { %v1243_v51 = vmul.f32 %v2553_v7, %v1163_v29  ;;  %v1244_v4 = vmul.f32 %v2560_v62, %v1164_v26  ;;  %v1157_v22 = vadd.f32 0.0729, %v1149_v17  ;;  %v1158_v49 = vadd.f32 0.0729, %v1150_v50 }
 0x17d   : > { %v1135_v16 = vmul.f32 9.0, %v1087_v63  ;;  %v1136_v15 = vmul.f32 9.0, %v1088_v14  ;;  %v1057_v10 = vrot.slane %v2615_v52, 1  ;;  %v1009_v42 = vadd.f32 %v1001_v61, %v993_v46 }
 0x17e   : > { %v1251_v34 = vsub.f32 1.0, %v1243_v51  ;;  %v1252_v54 = vsub.f32 1.0, %v1244_v4  ;;  %v1165_v27 = vmul.f32 %v1157_v22, %v2543_v58  ;;  %v1166_v36 = vmul.f32 %v1158_v49, %v2545_v24 }
 0x17f   : > { %v1498_v33 = vpop.eup %1497  ;;  %v1143_v1 = vsub.f32 %v1135_v16, %v2515_v56  ;;  %v1144_v7 = vsub.f32 %v1136_v15, %v2523_v39  ;;  %v1018_v9 = vrot.slane %v1009_v42, 1  ;;  %v1036_v62 = vrot.slane %v1009_v42, 7 }
 0x180   : > { %v1259_v41 = vmul.f32 0.5, %v1251_v34  ;;  %v1260_v60 = vmul.f32 0.5, %v1252_v54  ;;  %v1245_v25 = vmul.f32 %v2584_v44, %v1165_v27  ;;  %v1246_v43 = vmul.f32 %v2593_v3, %v1166_v36 }
 0x181   : > { %v1151_v23 = vmul.f32 2.0, %v1143_v1  ;;  %v1152_v47 = vmul.f32 2.0, %v1144_v7  ;;  %v1038_v45 = vsel %vm329_vm3, %v1036_v62, %v1037_v11  ;;  %v1050_v58 = vsel %vm329_vm3, %v1018_v9, %v1036_v62 }
 0x182   : > { %v1267_v24 = vmax.f32 %v1259_v41, 0.0  ;;  %v1268_v38 = vmax.f32 %v1260_v60, 0.0  ;;  %v1253_v56 = vsub.f32 1.0, %v1245_v25  ;;  %v1254_v37 = vsub.f32 1.0, %v1246_v43 }
 0x183   : > { %v1159_v39 = vadd.f32 0.0729, %v1151_v23  ;;  %v1160_v55 = vadd.f32 0.0729, %v1152_v47  ;;  %v1058_v0 = vsel %vm354_vm2, %v1018_v9, %v1057_v10  ;;  %v1081_v20 = vadd.f32 %v1050_v58, %v1009_v42 }
 0x184   : > { %v1275_v8 = vmin.f32 %v1267_v24, 1.0  ;;  %v1276_v44 = vmin.f32 %v1268_v38, 1.0  ;;  %v1261_v6 = vmul.f32 0.5, %v1253_v56  ;;  %v1262_v3 = vmul.f32 0.5, %v1254_v37 }
 0x185   : > { %v1167_v18 = vmul.f32 %v1159_v39, %v2548_v32  ;;  %v1168_v57 = vmul.f32 %v1160_v55, %v2555_v13  ;;  %v1082_v31 = vadd.f32 %v1038_v45, %v2615_v52  ;;  %v1089_v30 = vadd.f32 %v1081_v20, %v1058_v0 }
 0x186   : > { %1499 = vrcp.f32 %v2569_v48  ;;  %1284 = vst.msk [vmem:[%s2648_s6] sm:$0xff] %vm1283_vm4, %v1275_v8  ;;  %1285 = vst.msk [vmem:[%s2648_s6 + $0x8] sm:$0xff] %vm1283_vm4, %v1276_v44  ;;  %v1269_v12 = vmax.f32 %v1261_v6, 0.0  ;;  %v1270_v21 = vmax.f32 %v1262_v3, 0.0  ;;  %v1074_v32 = vsel %vm354_vm2, %v1057_v10, %v1037_v11 }
 0x187   : > { %v1247_v13 = vmul.f32 %v2607_v59, %v1167_v18  ;;  %v1248_v52 = vmul.f32 %v1498_v33, %v1168_v57  ;;  %v1090_v35 = vadd.f32 %v1082_v31, %v1074_v32  ;;  %v1137_v19 = vmul.f32 9.0, %v1089_v30 }
 0x188   : > { %v1121_v48 = vmul.f32 2.0, %v2563_v28  ;;  %1501 = vrcp.f32 %v2575_v40  ;;  %v1277_v2 = vmin.f32 %v1269_v12, 1.0  ;;  %v1278_v29 = vmin.f32 %v1270_v21, 1.0 }
 0x189   : > { %v1255_v26 = vsub.f32 1.0, %v1247_v13  ;;  %v1256_v17 = vsub.f32 1.0, %v1248_v52  ;;  %v1138_v50 = vmul.f32 9.0, %v1090_v35  ;;  %v1145_v63 = vsub.f32 %v1137_v19, %v2563_v28 }
 0x18a   : > { %v1122_v14 = vmul.f32 2.0, %v2567_v5  ;;  %1286 = vst.msk [vmem:[%s2648_s6 + $0x10] sm:$0xff] %vm1283_vm4, %v1277_v2  ;;  %1287 = vst.msk [vmem:[%s2648_s6 + $0x18] sm:$0xff] %vm1283_vm4, %v1278_v29  ;;  %v1129_v53 = vadd.f32 0.0081, %v1121_v48 }
 0x18b   : > { %v1263_v59 = vmul.f32 0.5, %v1255_v26  ;;  %v1264_v11 = vmul.f32 0.5, %v1256_v17  ;;  %v1146_v46 = vsub.f32 %v1138_v50, %v2567_v5  ;;  %v1153_v40 = vmul.f32 2.0, %v1145_v63 }
 0x18c   : > { %v1130_v49 = vadd.f32 0.0081, %v1122_v14 }
 0x18d   : > { %v1271_v61 = vmax.f32 %v1263_v59, 0.0  ;;  %v1272_v51 = vmax.f32 %v1264_v11, 0.0  ;;  %v1154_v4 = vmul.f32 2.0, %v1146_v46  ;;  %v1161_v22 = vadd.f32 0.0729, %v1153_v40 }
 0x18f   : > { %v1279_v28 = vmin.f32 %v1271_v61, 1.0  ;;  %v1280_v16 = vmin.f32 %v1272_v51, 1.0  ;;  %v1162_v15 = vadd.f32 0.0729, %v1154_v4  ;;  %v1169_v10 = vmul.f32 %v1161_v22, %v1129_v53 }
 0x190   : > { %v1500_v42 = vpop.eup %1499 }
 0x191   : > { %1288 = vst.msk [vmem:[%s2648_s6 + $0x20] sm:$0xff] %vm1283_vm4, %v1279_v28  ;;  %1289 = vst.msk [vmem:[%s2648_s6 + $0x28] sm:$0xff] %vm1283_vm4, %v1280_v16  ;;  %v1170_v34 = vmul.f32 %v1162_v15, %v1130_v49  ;;  %v1249_v5 = vmul.f32 %v1500_v42, %v1169_v10 }
 0x192   : > { %v1502_v54 = vpop.eup %1501 }
 0x193   : > { %v1250_v27 = vmul.f32 %v1502_v54, %v1170_v34  ;;  %v1257_v36 = vsub.f32 1.0, %v1249_v5 }
 0x195   : > { %v1258_v33 = vsub.f32 1.0, %v1250_v27  ;;  %v1265_v1 = vmul.f32 0.5, %v1257_v36 }
 0x197   : > { %v1266_v7 = vmul.f32 0.5, %v1258_v33  ;;  %v1273_v9 = vmax.f32 %v1265_v1, 0.0 }
 0x199   : > { %v1274_v62 = vmax.f32 %v1266_v7, 0.0  ;;  %v1281_v41 = vmin.f32 %v1273_v9, 1.0 }
 0x19b   : > { %v1282_v60 = vmin.f32 %v1274_v62, 1.0  ;;  %1290 = vst.msk [vmem:[%s2648_s6 + $0x30] sm:$0xff] %vm1283_vm4, %v1281_v41 }
 0x19d   : > { %1291 = vst.msk [vmem:[%s2648_s6 + $0x38] sm:$0xff] %vm1283_vm4, %v1282_v60 }
 0x19e   : > { %1576 = shalt.err (!%p1573_p11)
}
 0x19f   : > { %s1577_s16 = scalar_lea.hbm %s2674_s26, 1024  ;;  %s1581_s19 = scalar_lea.hbm %s2726_s2, 2048 }
 0x1a0   : > { %p1578_p3 = scmp.ne.s32.totalorder %s2674_s26, %s1577_s16  ;;  %p1582_p2 = scmp.lt.u32.totalorder %s2674_s26, %s2726_s2 }
 0x1a1   : > { %p1583_p4 = scmp.lt.u32.totalorder %s1581_s19, %s1577_s16  ;;  %p1585_p13 = scmp.lt.u32.totalorder %s1577_s16, %s2674_s26 }
 0x1a2   : > { %p1579_p8 = pnand %p1578_p3, %p2796_p1 }
 0x1a3   : > { %p1584_p6 = por %p1583_p4, %p1582_p2 }
 0x1a4   : > { %p1580_p0 = pneg %p1579_p8 }
 0x1a5   : > { %p1586_p12 = por %p1585_p13, %p1584_p6 }
 0x1a7   : > { %p1587_p10 = pnand %p1586_p12, %p1580_p0 }
 0x1a9   : > { %1590 = shalt.err (!%p1587_p10)
}
 0x1aa   : > { %s1642_s5 = smov 128   ;;  %s1643_s20 = smov 8  }
 0x1ab   : > { %1434 = dma.vmem_to_hbm [thread:$0]  (%p2796_p1), %s2676_s17, 1024, %s2674_s26, %s1293_s27, %s1642_s5, %s1642_s5, %s1643_s20  }
 0x1ac PF: > { %s1322_s6 = sand.u32 1, %s1621_s9   ;;  %p2797_p5 = scmp.ne.s32.totalorder %s2752_s22, 0 }
 0x1ad   : > { %p2798_p7 = scmp.ge.s32.totalorder %s1633_s12, 2  ;;  %s1323_s14 = scalar_lea.sflag [#allocation4], %s1322_s6 }
 0x1af   : > { %p1444_p9 = pnand %p2798_p7, %p2797_p5 }
 0x1b1   : > { %1616 = dma.done.wait (!%p1444_p9), %s1323_s14, 1024  }
 0x1b2   : > { %1618 = vsyncadd (!%p1444_p9), %s1323_s14, 4294966272  ;;  %p18_p11 = scmp.ge.s32.totalorder %s1684_s15, 4   ;;  %s2799_s9 = smov %s1625_s10 }
 0x1b3   : > { %s2800_s10 = smov %s1629_s11  ;;  %s2801_s11 = smov %s1696_s18 }
 0x1b4   : > { %s2802_s12 = smov %s1684_s15  ;;  %20 = sbr.rel (!%p18_p11) target bundleno = 7 (0x7), region = 86 }
 0x1bb   :  { %1328 = vsyncpa [#allocation3], 1 }
 0x1bc   :  { %1330 = vsyncpa [#allocation3 + $0x1], 1 }
 0x1bd   :  { %1331 = vsyncpa [#allocation6], 1 }
 0x1be   :  { %1333 = vsyncpa [#allocation6 + $0x1], 1 }
 0x1bf   :  { %1334 = vsyncpa [#allocation4], 1 }
 0x1c0   :  { %1336 = vsyncpa [#allocation4 + $0x1], 1 }

</bundles_post_ra>
